<compile_context>
chip_gen: v7x
topology: tpu7x:2x2x1
jax: 0.10.0
libtpu: 0.0.40
codegen_flags: <defaults>
</compile_context>

<pallas_src>
import jax
import jax.numpy as jnp
from jax.experimental import pallas as pl
from jax.experimental.pallas import tpu as pltpu

_BN_EPS = 1e-5

_VMEM_SPEC = pl.BlockSpec(memory_space=pltpu.MemorySpace.VMEM)


# ---------------------------------------------------------------------------
# Fused kernel: all hidden (Linear -> BN -> ReLU) layers + final Linear+sigmoid
# ---------------------------------------------------------------------------
def _make_fused_generator_kernel(n_hidden):
    """Build a fused kernel for `n_hidden` hidden layers.

    Ref order (all resident in VMEM, no grid):
      x, [w_t, gamma, beta] * n_hidden, w_final_t, b_final, out
    """

    def kernel(*refs):
        x_ref = refs[0]
        o_ref = refs[-1]

        h = x_ref[...]
        idx = 1
        for _ in range(n_hidden):
            w = refs[idx][...]          # [in, out]
            gamma = refs[idx + 1][...]  # [1, out]
            beta = refs[idx + 2][...]   # [1, out]
            idx += 3

            # Linear (bias omitted: it cancels under the BN mean subtraction).
            y = jnp.dot(h, w, preferred_element_type=jnp.float32)

            # BatchNorm1d over the batch axis (biased variance, f32 stats).
            mean = jnp.mean(y, axis=0, keepdims=True)
            centered = y - mean
            var = jnp.mean(centered * centered, axis=0, keepdims=True)

            # Fold the affine: relu(gamma * (y-mean)*inv_std + beta)
            #                = relu(y*scale + shift)
            scale = gamma * jax.lax.rsqrt(var + _BN_EPS)   # [1, out], EUP rsqrt
            shift = beta - scale * mean                    # [1, out]
            h = jnp.maximum(y * scale + shift, 0.0)

        w_f = refs[idx][...]      # [last_hidden, outputs]
        b_f = refs[idx + 1][...]  # [1, outputs]
        y = jnp.dot(h, w_f, preferred_element_type=jnp.float32) + b_f
        o_ref[...] = jax.nn.sigmoid(y).astype(o_ref.dtype)

    return kernel


def _cost_estimate(batch, layer_dims, outputs):
    """Advisory cost hint for XLA scheduling around the fused custom call."""
    flops = 0
    bytes_accessed = 0
    for in_f, out_f in layer_dims:
        flops += 2 * batch * in_f * out_f
        bytes_accessed += (in_f * out_f + 2 * out_f) * 4      # w_t, gamma, beta
    last_in = layer_dims[-1][1]
    flops += 2 * batch * last_in * outputs
    bytes_accessed += (last_in * outputs + outputs) * 4        # w_final, b_final
    bytes_accessed += batch * layer_dims[0][0] * 4             # x
    bytes_accessed += batch * outputs * 4                      # output
    # rsqrt per hidden feature + sigmoid per output element.
    transcendentals = sum(o for _, o in layer_dims) + batch * outputs
    return pl.CostEstimate(
        flops=flops,
        transcendentals=transcendentals,
        bytes_accessed=bytes_accessed,
    )


# ---------------------------------------------------------------------------
# Parameter construction (deterministic, PyTorch-default-style init)
# ---------------------------------------------------------------------------
def init_generator_params(key, inputs_list, neurons_list, outputs):
    params = {"hidden": [], "final": None}
    for inputs, neurons in zip(inputs_list, neurons_list):
        key, kw, kb = jax.random.split(key, 3)
        bound = 1.0 / (inputs ** 0.5)
        w = jax.random.uniform(kw, (neurons, inputs), jnp.float32, -bound, bound)
        b = jax.random.uniform(kb, (neurons,), jnp.float32, -bound, bound)
        params["hidden"].append(
            {
                "w_t": w.T,                                   # [in, out]
                "b": b.reshape(1, -1),                        # reference only
                "gamma": jnp.ones((1, neurons), jnp.float32),
                "beta": jnp.zeros((1, neurons), jnp.float32),
            }
        )
    key, kw, kb = jax.random.split(key, 3)
    last_in = neurons_list[-1]
    bound = 1.0 / (last_in ** 0.5)
    w = jax.random.uniform(kw, (outputs, last_in), jnp.float32, -bound, bound)
    b = jax.random.uniform(kb, (outputs,), jnp.float32, -bound, bound)
    params["final"] = {"w_t": w.T, "b": b.reshape(1, -1)}
    return params


# ---------------------------------------------------------------------------
# Generator forward (single fused pallas_call)
# ---------------------------------------------------------------------------
@jax.jit
def generator_forward(params, x):
    batch = x.shape[0]
    n_hidden = len(params["hidden"])
    outputs = params["final"]["w_t"].shape[1]

    args = [x]
    layer_dims = []
    for layer in params["hidden"]:
        args += [layer["w_t"], layer["gamma"], layer["beta"]]
        layer_dims.append(layer["w_t"].shape)
    args += [params["final"]["w_t"], params["final"]["b"]]

    out = pl.pallas_call(
        _make_fused_generator_kernel(n_hidden),
        out_shape=jax.ShapeDtypeStruct((batch, outputs), jnp.float32),
        in_specs=[_VMEM_SPEC] * len(args),
        out_specs=_VMEM_SPEC,
        cost_estimate=_cost_estimate(batch, layer_dims, outputs),
    )(*args)

    # x_hat.view([-1, 3, 32, 32])  -- NCHW, pure reshape glue.
    return out.reshape(-1, 3, 32, 32)


# ---------------------------------------------------------------------------
# Pure-JAX reference (includes the hidden-layer bias; it cancels under BN)
# ---------------------------------------------------------------------------
def generator_forward_ref(params, x):
    h = x
    for layer in params["hidden"]:
        y = h @ layer["w_t"] + layer["b"]
        mean = jnp.mean(y, axis=0, keepdims=True)
        var = jnp.mean((y - mean) ** 2, axis=0, keepdims=True)
        y_hat = (y - mean) / jnp.sqrt(var + _BN_EPS)
        h = jnp.maximum(layer["gamma"] * y_hat + layer["beta"], 0.0)
    out = jax.nn.sigmoid(h @ params["final"]["w_t"] + params["final"]["b"])
    return out.reshape(-1, 3, 32, 32)


if __name__ == "__main__":
    # Small config: latent dim 32, hidden layers [64, 128], output 3*32*32.
    inputs_list = [32, 64]
    neurons_list = [64, 128]
    outputs = 3 * 32 * 32
    batch = 2

    key = jax.random.PRNGKey(0)
    key, pkey, xkey = jax.random.split(key, 3)
    params = init_generator_params(pkey, inputs_list, neurons_list, outputs)
    x = jax.random.normal(xkey, (batch, inputs_list[0]), jnp.float32)

    x_hat = generator_forward(params, x)
    x_hat = jax.block_until_ready(x_hat)

    assert x_hat.shape == (batch, 3, 32, 32), x_hat.shape
    ref = generator_forward_ref(params, x)
    # Bias-drop + affine folding in the hidden layers is mathematically exact
    # under BN; only FP-order differences remain, so a tight tolerance holds.
    max_err = float(jnp.max(jnp.abs(x_hat - ref)))
    assert jnp.allclose(x_hat, ref, atol=1e-4, rtol=1e-4), max_err

    print("KERNEL_OK")
</pallas_src>

<mosaic_0001>
module attributes {stable_mosaic.version = 11 : i64} {
  func.func @kernel(%arg0: memref<2x32xf32, #tpu.memory_space<vmem>>, %arg1: memref<32x64xf32, #tpu.memory_space<vmem>>, %arg2: memref<1x64xf32, #tpu.memory_space<vmem>>, %arg3: memref<1x64xf32, #tpu.memory_space<vmem>>, %arg4: memref<64x128xf32, #tpu.memory_space<vmem>>, %arg5: memref<1x128xf32, #tpu.memory_space<vmem>>, %arg6: memref<1x128xf32, #tpu.memory_space<vmem>>, %arg7: memref<128x3072xf32, #tpu.memory_space<vmem>>, %arg8: memref<1x3072xf32, #tpu.memory_space<vmem>>, %arg9: memref<2x3072xf32, #tpu.memory_space<vmem>>) attributes {dimension_semantics = [], scalar_prefetch = 0 : i64, scratch_operands = 0 : i64, tpu.core_type = #tpu.core_type<tc>} {
    %c0 = arith.constant 0 : index
    %c0_0 = arith.constant 0 : index
    %0 = vector.load %arg0[%c0, %c0_0] : memref<2x32xf32, #tpu.memory_space<vmem>>, vector<2x32xf32>
    %c0_1 = arith.constant 0 : index
    %c0_2 = arith.constant 0 : index
    %1 = vector.load %arg1[%c0_1, %c0_2] : memref<32x64xf32, #tpu.memory_space<vmem>>, vector<32x64xf32>
    %c0_3 = arith.constant 0 : index
    %c0_4 = arith.constant 0 : index
    %2 = vector.load %arg2[%c0_3, %c0_4] : memref<1x64xf32, #tpu.memory_space<vmem>>, vector<1x64xf32>
    %c0_5 = arith.constant 0 : index
    %c0_6 = arith.constant 0 : index
    %3 = vector.load %arg3[%c0_5, %c0_6] : memref<1x64xf32, #tpu.memory_space<vmem>>, vector<1x64xf32>
    %cst = arith.constant dense<0.000000e+00> : vector<2x64xf32>
    %4 = tpu.matmul %0, %1, %cst {dimension_numbers = #tpu.dot_dimension_numbers<[1], [0], [0], [1], [0, 0, 1, 1], [], []>} : vector<2x32xf32>, vector<32x64xf32>, vector<2x64xf32> -> vector<2x64xf32>
    %cst_7 = arith.constant dense<0.000000e+00> : vector<64xf32>
    %5 = vector.multi_reduction <add>, %4, %cst_7 [0] : vector<2x64xf32> to vector<64xf32>
    %6 = vector.shape_cast %5 : vector<64xf32> to vector<1x64xf32>
    %cst_8 = arith.constant 2.000000e+00 : f32
    %7 = vector.broadcast %cst_8 : f32 to vector<1x64xf32>
    %8 = arith.divf %6, %7 : vector<1x64xf32>
    %9 = vector.broadcast %8 : vector<1x64xf32> to vector<2x64xf32>
    %10 = arith.subf %4, %9 : vector<2x64xf32>
    %11 = arith.mulf %10, %10 : vector<2x64xf32>
    %cst_9 = arith.constant dense<0.000000e+00> : vector<64xf32>
    %12 = vector.multi_reduction <add>, %11, %cst_9 [0] : vector<2x64xf32> to vector<64xf32>
    %13 = vector.shape_cast %12 : vector<64xf32> to vector<1x64xf32>
    %cst_10 = arith.constant 2.000000e+00 : f32
    %14 = vector.broadcast %cst_10 : f32 to vector<1x64xf32>
    %15 = arith.divf %13, %14 : vector<1x64xf32>
    %cst_11 = arith.constant 9.99999974E-6 : f32
    %16 = vector.broadcast %cst_11 : f32 to vector<1x64xf32>
    %17 = arith.addf %15, %16 : vector<1x64xf32>
    %18 = math.rsqrt %17 : vector<1x64xf32>
    %19 = arith.mulf %2, %18 : vector<1x64xf32>
    %20 = arith.mulf %19, %8 : vector<1x64xf32>
    %21 = arith.subf %3, %20 : vector<1x64xf32>
    %22 = vector.broadcast %19 : vector<1x64xf32> to vector<2x64xf32>
    %23 = arith.mulf %4, %22 : vector<2x64xf32>
    %24 = vector.broadcast %21 : vector<1x64xf32> to vector<2x64xf32>
    %25 = arith.addf %23, %24 : vector<2x64xf32>
    %cst_12 = arith.constant 0.000000e+00 : f32
    %26 = vector.broadcast %cst_12 : f32 to vector<2x64xf32>
    %27 = arith.maximumf %25, %26 : vector<2x64xf32>
    %c0_13 = arith.constant 0 : index
    %c0_14 = arith.constant 0 : index
    %28 = vector.load %arg4[%c0_13, %c0_14] : memref<64x128xf32, #tpu.memory_space<vmem>>, vector<64x128xf32>
    %c0_15 = arith.constant 0 : index
    %c0_16 = arith.constant 0 : index
    %29 = vector.load %arg5[%c0_15, %c0_16] : memref<1x128xf32, #tpu.memory_space<vmem>>, vector<1x128xf32>
    %c0_17 = arith.constant 0 : index
    %c0_18 = arith.constant 0 : index
    %30 = vector.load %arg6[%c0_17, %c0_18] : memref<1x128xf32, #tpu.memory_space<vmem>>, vector<1x128xf32>
    %cst_19 = arith.constant dense<0.000000e+00> : vector<2x128xf32>
    %31 = tpu.matmul %27, %28, %cst_19 {dimension_numbers = #tpu.dot_dimension_numbers<[1], [0], [0], [1], [0, 0, 1, 1], [], []>} : vector<2x64xf32>, vector<64x128xf32>, vector<2x128xf32> -> vector<2x128xf32>
    %cst_20 = arith.constant dense<0.000000e+00> : vector<128xf32>
    %32 = vector.multi_reduction <add>, %31, %cst_20 [0] : vector<2x128xf32> to vector<128xf32>
    %33 = vector.shape_cast %32 : vector<128xf32> to vector<1x128xf32>
    %cst_21 = arith.constant 2.000000e+00 : f32
    %34 = vector.broadcast %cst_21 : f32 to vector<1x128xf32>
    %35 = arith.divf %33, %34 : vector<1x128xf32>
    %36 = vector.broadcast %35 : vector<1x128xf32> to vector<2x128xf32>
    %37 = arith.subf %31, %36 : vector<2x128xf32>
    %38 = arith.mulf %37, %37 : vector<2x128xf32>
    %cst_22 = arith.constant dense<0.000000e+00> : vector<128xf32>
    %39 = vector.multi_reduction <add>, %38, %cst_22 [0] : vector<2x128xf32> to vector<128xf32>
    %40 = vector.shape_cast %39 : vector<128xf32> to vector<1x128xf32>
    %cst_23 = arith.constant 2.000000e+00 : f32
    %41 = vector.broadcast %cst_23 : f32 to vector<1x128xf32>
    %42 = arith.divf %40, %41 : vector<1x128xf32>
    %cst_24 = arith.constant 9.99999974E-6 : f32
    %43 = vector.broadcast %cst_24 : f32 to vector<1x128xf32>
    %44 = arith.addf %42, %43 : vector<1x128xf32>
    %45 = math.rsqrt %44 : vector<1x128xf32>
    %46 = arith.mulf %29, %45 : vector<1x128xf32>
    %47 = arith.mulf %46, %35 : vector<1x128xf32>
    %48 = arith.subf %30, %47 : vector<1x128xf32>
    %49 = vector.broadcast %46 : vector<1x128xf32> to vector<2x128xf32>
    %50 = arith.mulf %31, %49 : vector<2x128xf32>
    %51 = vector.broadcast %48 : vector<1x128xf32> to vector<2x128xf32>
    %52 = arith.addf %50, %51 : vector<2x128xf32>
    %cst_25 = arith.constant 0.000000e+00 : f32
    %53 = vector.broadcast %cst_25 : f32 to vector<2x128xf32>
    %54 = arith.maximumf %52, %53 : vector<2x128xf32>
    %c0_26 = arith.constant 0 : index
    %c0_27 = arith.constant 0 : index
    %55 = vector.load %arg7[%c0_26, %c0_27] : memref<128x3072xf32, #tpu.memory_space<vmem>>, vector<128x3072xf32>
    %c0_28 = arith.constant 0 : index
    %c0_29 = arith.constant 0 : index
    %56 = vector.load %arg8[%c0_28, %c0_29] : memref<1x3072xf32, #tpu.memory_space<vmem>>, vector<1x3072xf32>
    %cst_30 = arith.constant dense<0.000000e+00> : vector<2x3072xf32>
    %57 = tpu.matmul %54, %55, %cst_30 {dimension_numbers = #tpu.dot_dimension_numbers<[1], [0], [0], [1], [0, 0, 1, 1], [], []>} : vector<2x128xf32>, vector<128x3072xf32>, vector<2x3072xf32> -> vector<2x3072xf32>
    %58 = vector.broadcast %56 : vector<1x3072xf32> to vector<2x3072xf32>
    %59 = arith.addf %57, %58 : vector<2x3072xf32>
    %60 = arith.negf %59 : vector<2x3072xf32>
    %61 = math.exp %60 : vector<2x3072xf32>
    %cst_31 = arith.constant 1.000000e+00 : f32
    %62 = vector.broadcast %cst_31 : f32 to vector<2x3072xf32>
    %63 = arith.addf %62, %61 : vector<2x3072xf32>
    %64 = arith.divf %62, %63 : vector<2x3072xf32>
    %c0_32 = arith.constant 0 : index
    %c0_33 = arith.constant 0 : index
    %65 = vector.load %arg9[%c0_32, %c0_33] : memref<2x3072xf32, #tpu.memory_space<vmem>>, vector<2x3072xf32>
    tpu.vector_store %arg9[%c0_32, %c0_33], %64 {strides = array<i32>} : memref<2x3072xf32, #tpu.memory_space<vmem>>, vector<2x3072xf32>,
    return
  }
}

</mosaic_0001>

<bundles_post_ra>
// kernel: generator_forward.1
= control target key start
LH: loop header
LB: loop body
LE: loop exit
PB: predicated region body
PF: predicated region fallthrough
CT: control target
= control target key end

     0   :  { %14 = vsyncpa [#allocation3], 0  ;;  %s3162_s0 = inlined_call_operand.hbm [shape: f32[2,32], index: 0, kind: input, shape index: {}]   ;;  %s3163_s1 = inlined_call_operand.hbm [shape: f32[32,64], index: 1, kind: input, shape index: {}]   ;;  %s3164_s2 = inlined_call_operand.hbm [shape: f32[1,64], index: 2, kind: input, shape index: {}]   ;;  %s3165_s3 = inlined_call_operand.hbm [shape: f32[1,64], index: 3, kind: input, shape index: {}]   ;;  %s3166_s4 = inlined_call_operand.hbm [shape: f32[64,128], index: 4, kind: input, shape index: {}]   ;;  %s3167_s5 = inlined_call_operand.hbm [shape: f32[1,128], index: 5, kind: input, shape index: {}]   ;;  %s3168_s6 = inlined_call_operand.hbm [shape: f32[1,128], index: 6, kind: input, shape index: {}]   ;;  %s3169_s7 = inlined_call_operand.hbm [shape: f32[128,3072], index: 7, kind: input, shape index: {}]   ;;  %s3170_s8 = inlined_call_operand.hbm [shape: f32[1,3072], index: 8, kind: input, shape index: {}]   ;;  %s3171_s9 = inlined_call_operand.vmem [shape: f32[2,3072], index: 9, kind: output, shape index: {}]  }
   0x1   :  { %15 = vsyncpa [#allocation5], 0 }
   0x2   :  { %16 = vsyncpa [#allocation8], 0 }
   0x3   :  { %17 = vsyncpa [#allocation11], 0 }
   0x4   :  { %18 = vsyncpa [#allocation14], 0  ;;  %s2836_s30 = smov [#allocation4]   ;;  %s2628_s13 = scalar_lea.hbm %s3163_s1, 512 }
   0x5   :  { %s34_s10 = sshll.u32 %s2836_s30, 4  ;;  %p2629_p0 = scmp.ne.s32.totalorder %s3163_s1, %s2628_s13  ;;  %s35_s10 = int_to_ptr.vmem [resolvable:$true] %s34_s10 }
   0x6   :  { %p2632_p1 = scmp.lt.u32.totalorder %s2628_s13, %s3163_s1 }
   0x8   :  { %p2634_p2 = pnand %p2632_p1, %p2629_p0 }
   0xa   :  { %2637 = shalt.err (!%p2634_p2)
}
   0xb   :  { %s2638_s18 = scalar_lea.vmem %s35_s10, 512  ;;  %p2643_p4 = scmp.lt.s32.totalorder %s35_s10, %s35_s10 }
   0xc   :  { %p2639_p3 = scmp.ne.s32.totalorder %s35_s10, %s2638_s18  ;;  %p2644_p5 = scmp.lt.s32.totalorder %s2638_s18, %s2638_s18 }
   0xe   :  { %p2645_p6 = por %p2644_p5, %p2643_p4 }
  0x10   :  { %p2646_p7 = pnand %p2645_p6, %p2639_p3 }
  0x12   :  { %2649 = shalt.err (!%p2646_p7)
}
  0x13   :  { %s2837_s19 = smov 128   ;;  %s2838_s20 = smov 8  }
  0x14   :  { %40 = dma.hbm_to_vmem [thread:$0]  %s3163_s1, 512, %s35_s10, [#allocation5], %s2837_s19, %s2837_s19, %s2838_s20  }
  0x15   :  { %s2839_s23 = smov [#allocation7]   ;;  %s2840_s25 = smov [#allocation10]  }
  0x16   :  { %s57_s24 = sshll.u32 %s2839_s23, 4  ;;  %s79_s26 = sshll.u32 %s2840_s25, 4  ;;  %s58_s24 = int_to_ptr.vmem [resolvable:$true] %s57_s24  ;;  %s80_s26 = int_to_ptr.vmem [resolvable:$true] %s79_s26 }
  0x17   :  { %s2650_s29 = scalar_lea.hbm %s3165_s3, 16 }
  0x18   :  { %p2651_p8 = scmp.ne.s32.totalorder %s3165_s3, %s2650_s29  ;;  %p2654_p9 = scmp.lt.u32.totalorder %s2650_s29, %s3165_s3 }
  0x1a   :  { %p2656_p10 = pnand %p2654_p9, %p2651_p8 }
  0x1c   :  { %2659 = shalt.err (!%p2656_p10)
}
  0x1d   :  { %s2660_s1 = scalar_lea.vmem %s58_s24, 16  ;;  %s2664_s10 = scalar_lea.vmem %s58_s24, 32 }
  0x1e   :  { %p2661_p11 = scmp.ne.s32.totalorder %s58_s24, %s2660_s1  ;;  %p2665_p12 = scmp.lt.s32.totalorder %s58_s24, %s58_s24 }
  0x1f   :  { %p2666_p13 = scmp.lt.s32.totalorder %s2664_s10, %s2660_s1 }
  0x21   :  { %p2667_p0 = por %p2666_p13, %p2665_p12 }
  0x23   :  { %p2668_p1 = pnand %p2667_p0, %p2661_p11 }
  0x25   :  { %2671 = shalt.err (!%p2668_p1)
}
  0x26   :  { %60 = dma.hbm_to_vmem [thread:$0]  %s3165_s3, 16, %s58_s24, [#allocation8]  }
  0x27   :  { %s2672_s18 = scalar_lea.hbm %s3167_s5, 16 }
  0x28   :  { %p2673_p2 = scmp.ne.s32.totalorder %s3167_s5, %s2672_s18  ;;  %p2676_p3 = scmp.lt.u32.totalorder %s2672_s18, %s3167_s5 }
  0x2a   :  { %p2678_p4 = pnand %p2676_p3, %p2673_p2 }
  0x2c   :  { %2681 = shalt.err (!%p2678_p4)
}
  0x2d   :  { %s2682_s27 = scalar_lea.vmem %s80_s26, 16  ;;  %s2686_s28 = scalar_lea.vmem %s80_s26, 32 }
  0x2e   :  { %p2683_p5 = scmp.ne.s32.totalorder %s80_s26, %s2682_s27  ;;  %p2687_p6 = scmp.lt.s32.totalorder %s80_s26, %s80_s26 }
  0x2f   :  { %p2688_p7 = scmp.lt.s32.totalorder %s2686_s28, %s2682_s27 }
  0x31   :  { %p2689_p8 = por %p2688_p7, %p2687_p6 }
  0x33   :  { %p2690_p9 = pnand %p2689_p8, %p2683_p5 }
  0x35   :  { %2693 = shalt.err (!%p2690_p9)
}
  0x36   :  { %82 = dma.hbm_to_vmem [thread:$0]  %s3167_s5, 16, %s80_s26, [#allocation11]  }
  0x37   :  { %s2841_s29 = smov [#allocation13]   ;;  %s2694_s13 = scalar_lea.hbm %s3169_s7, 49152 }
  0x38   :  { %s98_s30 = sshll.u32 %s2841_s29, 4  ;;  %p2695_p10 = scmp.ne.s32.totalorder %s3169_s7, %s2694_s13  ;;  %s99_s30 = int_to_ptr.vmem [resolvable:$true] %s98_s30 }
  0x39   :  { %p2698_p11 = scmp.lt.u32.totalorder %s2694_s13, %s3169_s7 }
  0x3b   :  { %p2700_p12 = pnand %p2698_p11, %p2695_p10 }
  0x3d   :  { %2703 = shalt.err (!%p2700_p12)
}
  0x3e   :  { %s2704_s16 = scalar_lea.vmem %s99_s30, 49152  ;;  %p2709_p0 = scmp.lt.s32.totalorder %s99_s30, %s99_s30 }
  0x3f   :  { %p2705_p13 = scmp.ne.s32.totalorder %s99_s30, %s2704_s16  ;;  %p2710_p1 = scmp.lt.s32.totalorder %s2704_s16, %s2704_s16 }
  0x41   :  { %p2711_p2 = por %p2710_p1, %p2709_p0 }
  0x43   :  { %p2712_p3 = pnand %p2711_p2, %p2705_p13 }
  0x45   :  { %2715 = shalt.err (!%p2712_p3)
}
  0x46   :  { %s2842_s5 = smov 3072   ;;  %s2843_s26 = smov 192  }
  0x47   :  { %104 = dma.hbm_to_vmem [thread:$0]  %s3169_s7, 49152, %s99_s30, [#allocation14], %s2842_s5, %s2842_s5, %s2843_s26  }
  0x48   :  { %s2844_s21 = smov [#allocation2]   ;;  %s2845_s23 = smov [#allocation6]  }
  0x49   :  { %s25_s22 = sshll.u32 %s2844_s21, 4  ;;  %s47_s25 = sshll.u32 %s2845_s23, 4  ;;  %s26_s22 = int_to_ptr.vmem [resolvable:$true] %s25_s22  ;;  %s48_s25 = int_to_ptr.vmem [resolvable:$true] %s47_s25 }
  0x4a   :  { %s2716_s3 = scalar_lea.hbm %s3162_s0, 32 }
  0x4b   :  { %p2717_p4 = scmp.ne.s32.totalorder %s3162_s0, %s2716_s3  ;;  %p2720_p5 = scmp.lt.u32.totalorder %s2716_s3, %s3162_s0 }
  0x4d   :  { %p2722_p6 = pnand %p2720_p5, %p2717_p4 }
  0x4f   :  { %2725 = shalt.err (!%p2722_p6)
}
  0x50   :  { %s2726_s7 = scalar_lea.vmem %s26_s22, 32  ;;  %p2731_p8 = scmp.lt.s32.totalorder %s26_s22, %s26_s22 }
  0x51   :  { %p2727_p7 = scmp.ne.s32.totalorder %s26_s22, %s2726_s7  ;;  %p2732_p9 = scmp.lt.s32.totalorder %s2726_s7, %s2726_s7 }
  0x53   :  { %p2733_p10 = por %p2732_p9, %p2731_p8 }
  0x55   :  { %p2734_p11 = pnand %p2733_p10, %p2727_p7 }
  0x57   :  { %2737 = shalt.err (!%p2734_p11)
}
  0x58   :  { %28 = dma.hbm_to_vmem [thread:$0]  %s3162_s0, 32, %s26_s22, [#allocation3]  }
  0x59   :  { %s2738_s14 = scalar_lea.hbm %s3164_s2, 16 }
  0x5a   :  { %p2739_p12 = scmp.ne.s32.totalorder %s3164_s2, %s2738_s14  ;;  %p2742_p13 = scmp.lt.u32.totalorder %s2738_s14, %s3164_s2 }
  0x5c   :  { %p2744_p0 = pnand %p2742_p13, %p2739_p12 }
  0x5e   :  { %2747 = shalt.err (!%p2744_p0)
}
  0x5f   :  { %s2748_s17 = scalar_lea.vmem %s48_s25, 16  ;;  %s2752_s18 = scalar_lea.vmem %s48_s25, 32 }
  0x60   :  { %p2749_p1 = scmp.ne.s32.totalorder %s48_s25, %s2748_s17  ;;  %p2753_p2 = scmp.lt.s32.totalorder %s48_s25, %s48_s25 }
  0x61   :  { %p2754_p3 = scmp.lt.s32.totalorder %s2752_s18, %s2748_s17 }
  0x63   :  { %p2755_p4 = por %p2754_p3, %p2753_p2 }
  0x65   :  { %p2756_p5 = pnand %p2755_p4, %p2749_p1 }
  0x67   :  { %2759 = shalt.err (!%p2756_p5)
}
  0x68   :  { %50 = dma.hbm_to_vmem [thread:$0]  %s3164_s2, 16, %s48_s25, [#allocation5]  }
  0x69   :  { %s2846_s22 = smov [#allocation9]   ;;  %s2847_s27 = smov [#allocation12]  }
  0x6a   :  { %s66_s23 = sshll.u32 %s2846_s22, 4  ;;  %s89_s28 = sshll.u32 %s2847_s27, 4  ;;  %s67_s23 = int_to_ptr.vmem [resolvable:$true] %s66_s23  ;;  %s90_s28 = int_to_ptr.vmem [resolvable:$true] %s89_s28 }
  0x6b   :  { %s2760_s29 = scalar_lea.hbm %s3166_s4, 1024 }
  0x6c   :  { %p2761_p6 = scmp.ne.s32.totalorder %s3166_s4, %s2760_s29  ;;  %p2764_p7 = scmp.lt.u32.totalorder %s2760_s29, %s3166_s4 }
  0x6e   :  { %p2766_p8 = pnand %p2764_p7, %p2761_p6 }
  0x70   :  { %2769 = shalt.err (!%p2766_p8)
}
  0x71   :  { %s2770_s2 = scalar_lea.vmem %s67_s23, 1024  ;;  %p2775_p10 = scmp.lt.s32.totalorder %s67_s23, %s67_s23 }
  0x72   :  { %p2771_p9 = scmp.ne.s32.totalorder %s67_s23, %s2770_s2  ;;  %p2776_p11 = scmp.lt.s32.totalorder %s2770_s2, %s2770_s2 }
  0x74   :  { %p2777_p12 = por %p2776_p11, %p2775_p10 }
  0x76   :  { %p2778_p13 = pnand %p2777_p12, %p2771_p9 }
  0x78   :  { %2781 = shalt.err (!%p2778_p13)
}
  0x79   :  { %72 = dma.hbm_to_vmem [thread:$0]  %s3166_s4, 1024, %s67_s23, [#allocation8], %s2837_s19, %s2837_s19, %s2838_s20  }
  0x7a   :  { %s2782_s14 = scalar_lea.hbm %s3168_s6, 16 }
  0x7b   :  { %p2783_p0 = scmp.ne.s32.totalorder %s3168_s6, %s2782_s14  ;;  %p2786_p1 = scmp.lt.u32.totalorder %s2782_s14, %s3168_s6 }
  0x7d   :  { %p2788_p2 = pnand %p2786_p1, %p2783_p0 }
  0x7f   :  { %2791 = shalt.err (!%p2788_p2)
}
  0x80   :  { %s2792_s17 = scalar_lea.vmem %s90_s28, 16  ;;  %s2796_s18 = scalar_lea.vmem %s90_s28, 32 }
  0x81   :  { %p2793_p3 = scmp.ne.s32.totalorder %s90_s28, %s2792_s17  ;;  %p2797_p4 = scmp.lt.s32.totalorder %s90_s28, %s90_s28 }
  0x82   :  { %p2798_p5 = scmp.lt.s32.totalorder %s2796_s18, %s2792_s17 }
  0x84   :  { %p2799_p6 = por %p2798_p5, %p2797_p4 }
  0x86   :  { %p2800_p7 = pnand %p2799_p6, %p2793_p3 }
  0x88   :  { %2803 = shalt.err (!%p2800_p7)
}
  0x89   :  { %92 = dma.hbm_to_vmem [thread:$0]  %s3168_s6, 16, %s90_s28, [#allocation11]  }
  0x8a   :  { %s2848_s20 = smov [#allocation15]   ;;  %s2804_s23 = scalar_lea.hbm %s3170_s8, 384 }
  0x8b   :  { %s111_s0 = sshll.u32 %s2848_s20, 4  ;;  %p2805_p8 = scmp.ne.s32.totalorder %s3170_s8, %s2804_s23  ;;  %s112_s0 = int_to_ptr.vmem [resolvable:$true] %s111_s0 }
  0x8c   :  { %p2808_p9 = scmp.lt.u32.totalorder %s2804_s23, %s3170_s8 }
  0x8e   :  { %p2810_p10 = pnand %p2808_p9, %p2805_p8 }
  0x90   :  { %2813 = shalt.err (!%p2810_p10)
}
  0x91   :  { %s2814_s11 = scalar_lea.vmem %s112_s0, 384  ;;  %p2819_p12 = scmp.lt.s32.totalorder %s112_s0, %s112_s0 }
  0x92   :  { %p2815_p11 = scmp.ne.s32.totalorder %s112_s0, %s2814_s11  ;;  %p2820_p13 = scmp.lt.s32.totalorder %s2814_s11, %s2814_s11 }
  0x94   :  { %p2821_p0 = por %p2820_p13, %p2819_p12 }
  0x96   :  { %p2822_p1 = pnand %p2821_p0, %p2815_p11 }
  0x98   :  { %2825 = shalt.err (!%p2822_p1)
}
  0x99   :  { %114 = dma.hbm_to_vmem [thread:$0]  %s3170_s8, 384, %s112_s0, [#allocation14]  }
  0x9a   :  { %2826 = dma.done.wait [#allocation3], 32  }
  0x9b   :  { %2827 = vsyncadd [#allocation3], 4294967264 }
  0x9c   :  { %2828 = dma.done.wait [#allocation5], 528  }
  0x9d   :  { %2829 = vsyncadd [#allocation5], 4294966768 }
  0x9e   :  { %2830 = dma.done.wait [#allocation8], 1040  }
  0x9f   :  { %2831 = vsyncadd [#allocation8], 4294966256 }
  0xa0   :  { %2832 = dma.done.wait [#allocation11], 32  }
  0xa1   :  { %2833 = vsyncadd [#allocation11], 4294967264 }
  0xa2   :  { %2834 = dma.done.wait [#allocation14], 49536  }
  0xa3   :  { %2835 = vsyncadd [#allocation14], 4294917760  ;;  %v2849_v0 = vmov 0.0|0.0   ;;  %vm2850_vm0 = vmmov 0   ;;  %v2851_v1 = vmov 0.0   ;;  %v143_v2 = vld [vmem:[#allocation4] sm:$0xff]  ;;  %v249_v42 = vlaneseq }
  0xa4   :  { %2109 = vmatprep.subr.bf16.mxu0 %v2849_v0  ;;  %2087 = vmatprep.mubr.msk.f32.mxu0 %vm2850_vm0, %v2851_v1  ;;  %v144_v3 = vld [vmem:[#allocation4 + $0x8] sm:$0xff]  ;;  %v145_v4 = vld [vmem:[#allocation4 + $0x10] sm:$0xff]  ;;  %v146_v6 = vld [vmem:[#allocation4 + $0x18] sm:$0xff]  ;;  %vm149_vm1 = vcmask 261120   ;;  %vm223_vm2 = vcmask 517120   ;;  %vm273_vm3 = vcmask 523264  }
  0xa5   :  { %2115 = vmatprep.subr.bf16.mxu1 %v2849_v0  ;;  %2106 = vmatprep.mubr.msk.f32.mxu1 %vm2850_vm0, %v2851_v1  ;;  %v2110_v5 = vpack.c.bf16 %v144_v3, %v143_v2  ;;  %v2113_v7 = vpack.c.bf16 %v146_v6, %v145_v4  ;;  %v142_v8 = vld [vmem:[#allocation2] sm:$0x3]  ;;  %v263_v9 = vld [vmem:[#allocation9] sm:$0xff]  ;;  %v264_v10 = vld [vmem:[#allocation9 + $0x8] sm:$0xff]  ;;  %v3020_v43 = vshrl.u32 %v249_v42, 7  ;;  %vm347_vm4 = vcmask 1041408  }
  0xa6   :  { %v2116_v11 = vpack.c.bf16 %v264_v10, %v263_v9  ;;  %v265_v12 = vld [vmem:[#allocation9 + $0x10] sm:$0xff]  ;;  %v266_v13 = vld [vmem:[#allocation9 + $0x18] sm:$0xff]  ;;  %v267_v15 = vld [vmem:[#allocation9 + $0x20] sm:$0xff] }
  0xa7   :  { %2111 = vmatpush3.bf16.msra.mxu0 %v2110_v5  ;;  %v2119_v14 = vpack.c.bf16 %v266_v13, %v265_v12  ;;  %v268_v16 = vld [vmem:[#allocation9 + $0x28] sm:$0xff]  ;;  %v269_v18 = vld [vmem:[#allocation9 + $0x30] sm:$0xff]  ;;  %v270_v19 = vld [vmem:[#allocation9 + $0x38] sm:$0xff]  ;;  %v3023_v45 = vsub.s32 0, %v3020_v43 }
  0xa8   :  { %2112 = vmatprep.subr.bf16.mxu0 %v2849_v0  ;;  %2117 = vmatpush3.bf16.msra.mxu1 %v2116_v11  ;;  %v2122_v17 = vpack.c.bf16 %v268_v16, %v267_v15  ;;  %v2125_v20 = vpack.c.bf16 %v270_v19, %v269_v18  ;;  %v147_v44 = vld [vmem:[#allocation6] sm:$0x1]  ;;  %v148_v48 = vld [vmem:[#allocation7] sm:$0x1]  ;;  %v387_v56 = vld [vmem:[#allocation13 + $0x8] sm:$0xff] }
  0xa9   :  { %2118 = vmatprep.subr.bf16.mxu1 %v2849_v0  ;;  %v411_v57 = vld [vmem:[#allocation13 + $0xc8] sm:$0xff]  ;;  %v389_v58 = vld [vmem:[#allocation13 + $0x18] sm:$0xff]  ;;  %v386_v61 = vld [vmem:[#allocation13] sm:$0xff] }
  0xaa   :  { %v2127_v59 = vpack.c.bf16 %v411_v57, %v387_v56  ;;  %v413_v60 = vld [vmem:[#allocation13 + $0xd8] sm:$0xff]  ;;  %v410_v62 = vld [vmem:[#allocation13 + $0xc0] sm:$0xff]  ;;  %v388_v2 = vld [vmem:[#allocation13 + $0x10] sm:$0xff] }
  0xab   :  { %2114 = vmatpush3.bf16.msra.mxu0 %v2113_v7  ;;  %v2159_v63 = vpack.c.bf16 %v413_v60, %v389_v58  ;;  %v412_v3 = vld [vmem:[#allocation13 + $0xd0] sm:$0xff]  ;;  %v435_v5 = vld [vmem:[#allocation13 + $0x188] sm:$0xff]  ;;  %v437_v7 = vld [vmem:[#allocation13 + $0x198] sm:$0xff] }
  0xac   :  { %2120 = vmatpush3.bf16.msra.mxu1 %v2119_v14  ;;  %2128 = vmatprep.subr.bf16.mxu0 %v2127_v59  ;;  %v2161_v4 = vpack.c.bf16 %v412_v3, %v388_v2  ;;  %v459_v6 = vld [vmem:[#allocation13 + $0x248] sm:$0xff]  ;;  %v461_v9 = vld [vmem:[#allocation13 + $0x258] sm:$0xff]  ;;  %v434_v10 = vld [vmem:[#allocation13 + $0x180] sm:$0xff] }
  0xad   :  { %2121 = vmatprep.subr.bf16.mxu1 %v2849_v0  ;;  %v458_v11 = vld [vmem:[#allocation13 + $0x240] sm:$0xff]  ;;  %v2163_v12 = vpack.c.bf16 %v461_v9, %v437_v7  ;;  %v436_v14 = vld [vmem:[#allocation13 + $0x190] sm:$0xff]  ;;  %v507_v18 = vld [vmem:[#allocation13 + $0x3c8] sm:$0xff] }
  0xae   :  { %2088 = vmatmul.mubr.msk.f32.vlgmr.msra.gmra.mrb[0].mxu0 %vm149_vm1, %v142_v8  ;;  %v2131_v8 = vpack.c.bf16 %v459_v6, %v435_v5  ;;  %v2133_v13 = vpack.c.bf16 %v458_v11, %v434_v10  ;;  %v460_v15 = vld [vmem:[#allocation13 + $0x250] sm:$0xff]  ;;  %v485_v19 = vld [vmem:[#allocation13 + $0x318] sm:$0xff]  ;;  %v603_v42 = vld [vmem:[#allocation13 + $0x6c8] sm:$0xff] }
  0xaf   :  { %960 = vmatprep.mubr.f32.mxu0 %v2851_v1  ;;  %v2165_v16 = vpack.c.bf16 %v460_v15, %v436_v14  ;;  %v651_v56 = vld [vmem:[#allocation13 + $0x848] sm:$0xff]  ;;  %v629_v57 = vld [vmem:[#allocation13 + $0x798] sm:$0xff]  ;;  %v626_v60 = vld [vmem:[#allocation13 + $0x780] sm:$0xff] }
  0xb0   :  { %2123 = vmatpush3.bf16.msra.mxu1 %v2122_v17  ;;  %v483_v17 = vld [vmem:[#allocation13 + $0x308] sm:$0xff]  ;;  %v653_v59 = vld [vmem:[#allocation13 + $0x858] sm:$0xff]  ;;  %v652_v2 = vld [vmem:[#allocation13 + $0x850] sm:$0xff] }
  0xb1   :  { %2124 = vmatprep.subr.bf16.mxu1 %v2849_v0  ;;  %v2129_v0 = vpack.c.bf16 %v410_v62, %v386_v61  ;;  %v650_v61 = vld [vmem:[#allocation13 + $0x840] sm:$0xff]  ;;  %v2179_v62 = vpack.c.bf16 %v653_v59, %v629_v57  ;;  %v699_v5 = vld [vmem:[#allocation13 + $0x9c8] sm:$0xff]  ;;  %v677_v6 = vld [vmem:[#allocation13 + $0x918] sm:$0xff] }
  0xb2   :  { %v674_v9 = vld [vmem:[#allocation13 + $0x900] sm:$0xff]  ;;  %v700_v14 = vld [vmem:[#allocation13 + $0x9d0] sm:$0xff]  ;;  %v271_v57 = vld [vmem:[#allocation10] sm:$0x1] }
  0xb3   :  { %2130 = vmatpush1.bf16.msra.mxu0 %v2129_v0  ;;  %v628_v0 = vld [vmem:[#allocation13 + $0x790] sm:$0xff]  ;;  %v698_v10 = vld [vmem:[#allocation13 + $0x9c0] sm:$0xff] }
  0xb4   :  { %2126 = vmatpush3.bf16.msra.mxu1 %v2125_v20  ;;  %2132 = vmatprep.subr.bf16.mxu0 %v2131_v8  ;;  %v2135_v20 = vpack.c.bf16 %v507_v18, %v483_v17  ;;  %v2181_v3 = vpack.c.bf16 %v652_v2, %v628_v0  ;;  %v701_v8 = vld [vmem:[#allocation13 + $0x9d8] sm:$0xff]  ;;  %v747_v17 = vld [vmem:[#allocation13 + $0xb48] sm:$0xff]  ;;  %v390_v0 = vld [vmem:[#allocation13 + $0x20] sm:$0xff] }
  0xb5   :  { %2160 = vmatprep.subr.bf16.mxu1 %v2159_v63  ;;  %v2149_v63 = vpack.c.bf16 %v650_v61, %v626_v60  ;;  %v2183_v11 = vpack.c.bf16 %v701_v8, %v677_v6  ;;  %v725_v18 = vld [vmem:[#allocation13 + $0xa98] sm:$0xff]  ;;  %v414_v2 = vld [vmem:[#allocation13 + $0xe0] sm:$0xff]  ;;  %v416_v6 = vld [vmem:[#allocation13 + $0xf0] sm:$0xff] }
  0xb6   :  { %v272_v60 = vld [vmem:[#allocation12] sm:$0x1]  ;;  %v463_v8 = vld [vmem:[#allocation13 + $0x268] sm:$0xff] }
  0xb7   :  { %2134 = vmatpush1.bf16.msra.mxu0 %v2133_v13  ;;  %v676_v13 = vld [vmem:[#allocation13 + $0x910] sm:$0xff] }
  0xb8   :  { %2136 = vmatprep.subr.bf16.mxu0 %v2135_v20  ;;  %v2185_v15 = vpack.c.bf16 %v700_v14, %v676_v13  ;;  %v749_v20 = vld [vmem:[#allocation13 + $0xb58] sm:$0xff]  ;;  %v438_v14 = vld [vmem:[#allocation13 + $0x1a0] sm:$0xff] }
 0x181   :  { %v219_v21 = vpop.f32.mrb[0].mxu0 }
 0x182   :  { %v224_v22 = vsel %vm223_vm2, %v219_v21, 0.0  ;;  %v2089_v23 = vpop.f32.mrb[1].mxu0 }
 0x183   :  { %v225_v24 = vrot.slane %v224_v22, 4  ;;  %v506_v23 = vld [vmem:[#allocation13 + $0x3c0] sm:$0xff] }
 0x185   :  { %v226_v25 = vadd.f32 %v225_v24, %v224_v22  ;;  %v482_v22 = vld [vmem:[#allocation13 + $0x300] sm:$0xff] }
 0x187   :  { %v227_v26 = vrot.slane %v226_v25, 2 }
 0x189   :  { %v228_v27 = vadd.f32 %v227_v26, %v226_v25  ;;  %v2137_v25 = vpack.c.bf16 %v506_v23, %v482_v22  ;;  %v484_v26 = vld [vmem:[#allocation13 + $0x310] sm:$0xff]  ;;  %v746_v22 = vld [vmem:[#allocation13 + $0xb40] sm:$0xff]  ;;  %v2187_v23 = vpack.c.bf16 %v749_v20, %v725_v18 }
 0x18a   :  { %v464_v20 = vld [vmem:[#allocation13 + $0x270] sm:$0xff] }
 0x18b   :  { %v229_v28 = vrot.slane %v228_v27, 1  ;;  %2138 = vmatpush1.bf16.msra.mxu0 %v2137_v25  ;;  %v724_v25 = vld [vmem:[#allocation13 + $0xa90] sm:$0xff] }
 0x18d   :  { %v230_v29 = vadd.f32 %v229_v28, %v228_v27  ;;  %v508_v27 = vld [vmem:[#allocation13 + $0x3d0] sm:$0xff] }
 0x18e   :  { %v2169_v28 = vpack.c.bf16 %v508_v27, %v484_v26  ;;  %v748_v26 = vld [vmem:[#allocation13 + $0xb50] sm:$0xff] }
 0x18f   :  { %v232_v30 = vmul.f32 0.5, %v230_v29  ;;  %v531_v29 = vld [vmem:[#allocation13 + $0x488] sm:$0xff]  ;;  %v2189_v27 = vpack.c.bf16 %v748_v26, %v724_v25 }
 0x191   :  { %v233_v31 = vsub.f32 %v219_v21, %v232_v30 }
 0x193   :  { %v234_v32 = vmul.f32 %v233_v31, %v233_v31  ;;  %v533_v31 = vld [vmem:[#allocation13 + $0x498] sm:$0xff] }
 0x195   :  { %v235_v33 = vsel %vm223_vm2, %v234_v32, 0.0 }
 0x196   :  { %v236_v34 = vrot.slane %v235_v33, 4 }
 0x198   :  { %v237_v35 = vadd.f32 %v236_v34, %v235_v33  ;;  %v557_v33 = vld [vmem:[#allocation13 + $0x558] sm:$0xff]  ;;  %v530_v34 = vld [vmem:[#allocation13 + $0x480] sm:$0xff] }
 0x19a   :  { %v238_v36 = vrot.slane %v237_v35, 2 }
 0x19c   :  { %v239_v37 = vadd.f32 %v238_v36, %v237_v35  ;;  %v554_v35 = vld [vmem:[#allocation13 + $0x540] sm:$0xff]  ;;  %v2171_v36 = vpack.c.bf16 %v557_v33, %v533_v31 }
 0x19e   :  { %v240_v38 = vrot.slane %v239_v37, 1 }
 0x1a0   :  { %v241_v39 = vadd.f32 %v240_v38, %v239_v37  ;;  %v2141_v37 = vpack.c.bf16 %v554_v35, %v530_v34  ;;  %v532_v38 = vld [vmem:[#allocation13 + $0x490] sm:$0xff] }
 0x1a2   :  { %v242_v40 = vmul.f32 0.5, %v241_v39  ;;  %v556_v39 = vld [vmem:[#allocation13 + $0x550] sm:$0xff] }
 0x1a4   :  { %v243_v41 = vadd.f32 1e-05, %v242_v40  ;;  %v2173_v40 = vpack.c.bf16 %v556_v39, %v532_v38 }
 0x1a6   :  { %2528 = vrsqrt.f32 %v243_v41  ;;  %v579_v41 = vld [vmem:[#allocation13 + $0x608] sm:$0xff] }
 0x1b0   :  { %v2529_v46 = vpop.eup %2528 }
 0x1b1   :  { %v245_v47 = vmul.f32 %v2529_v46, %v147_v44  ;;  %v581_v44 = vld [vmem:[#allocation13 + $0x618] sm:$0xff]  ;;  %v2143_v46 = vpack.c.bf16 %v603_v42, %v579_v41 }
 0x1b3   :  { %v246_v49 = vmul.f32 %v245_v47, %v232_v30  ;;  %v252_v50 = vrot.slane %v245_v47, %v3023_v45  ;;  %v555_v30 = vld [vmem:[#allocation13 + $0x548] sm:$0xff]  ;;  %v605_v47 = vld [vmem:[#allocation13 + $0x6d8] sm:$0xff] }
 0x1b4   :  { %v2139_v32 = vpack.c.bf16 %v555_v30, %v531_v29  ;;  %v415_v29 = vld [vmem:[#allocation13 + $0xe8] sm:$0xff]  ;;  %v393_v30 = vld [vmem:[#allocation13 + $0x38] sm:$0xff] }
 0x1b5   :  { %v247_v51 = vsub.f32 %v148_v48, %v246_v49  ;;  %v254_v52 = vmul.f32 %v252_v50, %v219_v21  ;;  %v509_v21 = vld [vmem:[#allocation13 + $0x3d8] sm:$0xff]  ;;  %v578_v48 = vld [vmem:[#allocation13 + $0x600] sm:$0xff]  ;;  %v2175_v50 = vpack.c.bf16 %v605_v47, %v581_v44 }
 0x1b6   :  { %v2167_v24 = vpack.c.bf16 %v509_v21, %v485_v19  ;;  %2140 = vmatprep.subr.bf16.mxu0 %v2139_v32  ;;  %v602_v49 = vld [vmem:[#allocation13 + $0x6c0] sm:$0xff]  ;;  %v417_v32 = vld [vmem:[#allocation13 + $0xf8] sm:$0xff] }
 0x1b7   :  { %v259_v53 = vrot.slane %v247_v51, %v3023_v45  ;;  %2142 = vmatpush1.bf16.msra.mxu0 %v2141_v37  ;;  %v2145_v51 = vpack.c.bf16 %v602_v49, %v578_v48  ;;  %v722_v21 = vld [vmem:[#allocation13 + $0xa80] sm:$0xff]  ;;  %v2223_v33 = vpack.c.bf16 %v417_v32, %v393_v30  ;;  %v512_v32 = vld [vmem:[#allocation13 + $0x3f0] sm:$0xff] }
 0x1b8   :  { %2144 = vmatprep.subr.bf16.mxu0 %v2143_v46 }
 0x1b9   :  { %v261_v54 = vadd.f32 %v259_v53, %v254_v52  ;;  %v580_v52 = vld [vmem:[#allocation13 + $0x610] sm:$0xff] }
 0x1ba   :  { %v604_v53 = vld [vmem:[#allocation13 + $0x6d0] sm:$0xff] }
 0x1bb   :  { %v262_v55 = vmax.f32 %v261_v54, 0.0  ;;  %v2177_v54 = vpack.c.bf16 %v604_v53, %v580_v52  ;;  %2146 = vmatpush1.bf16.msra.mxu0 %v2145_v51 }
 0x1bd   :  { %2107 = vmatmul.mubr.msk.f32.vlgmr.msra.gmra.mrb[0].mxu1 %vm273_vm3, %v262_v55  ;;  %v627_v55 = vld [vmem:[#allocation13 + $0x788] sm:$0xff] }
 0x1be   :  { %1031 = vmatprep.mubr.f32.mxu1 %v2851_v1  ;;  %2162 = vmatpush1.bf16.msra.mxu1 %v2161_v4  ;;  %v2147_v58 = vpack.c.bf16 %v651_v56, %v627_v55  ;;  %v675_v4 = vld [vmem:[#allocation13 + $0x908] sm:$0xff] }
 0x1bf   :  { %2164 = vmatprep.subr.bf16.mxu1 %v2163_v12  ;;  %v2151_v7 = vpack.c.bf16 %v699_v5, %v675_v4  ;;  %v2153_v12 = vpack.c.bf16 %v698_v10, %v674_v9  ;;  %v392_v5 = vld [vmem:[#allocation13 + $0x30] sm:$0xff]  ;;  %v441_v9 = vld [vmem:[#allocation13 + $0x1b8] sm:$0xff] }
 0x1c0   :  { %2148 = vmatprep.subr.bf16.mxu0 %v2147_v58  ;;  %v465_v10 = vld [vmem:[#allocation13 + $0x278] sm:$0xff]  ;;  %v2225_v13 = vpack.c.bf16 %v416_v6, %v392_v5  ;;  %v632_v6 = vld [vmem:[#allocation13 + $0x7b0] sm:$0xff] }
 0x1c1   :  { %2150 = vmatpush1.bf16.msra.mxu0 %v2149_v63  ;;  %v2227_v18 = vpack.c.bf16 %v465_v10, %v441_v9  ;;  %v703_v9 = vld [vmem:[#allocation13 + $0x9e8] sm:$0xff]  ;;  %v681_v10 = vld [vmem:[#allocation13 + $0x938] sm:$0xff] }
 0x1c2   :  { %2166 = vmatpush1.bf16.msra.mxu1 %v2165_v16  ;;  %2152 = vmatprep.subr.bf16.mxu0 %v2151_v7  ;;  %v723_v16 = vld [vmem:[#allocation13 + $0xa88] sm:$0xff] }
 0x1c3   :  { %2168 = vmatprep.subr.bf16.mxu1 %v2167_v24  ;;  %v2155_v19 = vpack.c.bf16 %v747_v17, %v723_v16  ;;  %v2157_v24 = vpack.c.bf16 %v746_v22, %v722_v21  ;;  %v439_v7 = vld [vmem:[#allocation13 + $0x1a8] sm:$0xff] }
 0x1c4   :  { %v2195_v17 = vpack.c.bf16 %v463_v8, %v439_v7  ;;  %v487_v21 = vld [vmem:[#allocation13 + $0x328] sm:$0xff]  ;;  %v656_v7 = vld [vmem:[#allocation13 + $0x870] sm:$0xff] }
 0x1c5   :  { %2154 = vmatpush1.bf16.msra.mxu0 %v2153_v12  ;;  %v2193_v12 = vpack.c.bf16 %v414_v2, %v390_v0  ;;  %v511_v22 = vld [vmem:[#allocation13 + $0x3e8] sm:$0xff]  ;;  %v630_v2 = vld [vmem:[#allocation13 + $0x7a0] sm:$0xff] }
 0x1c6   :  { %2170 = vmatpush1.bf16.msra.mxu1 %v2169_v28  ;;  %2156 = vmatprep.subr.bf16.mxu0 %v2155_v19  ;;  %v391_v28 = vld [vmem:[#allocation13 + $0x28] sm:$0xff]  ;;  %v440_v19 = vld [vmem:[#allocation13 + $0x1b0] sm:$0xff] }
 0x1c7   :  { %2172 = vmatprep.subr.bf16.mxu1 %v2171_v36  ;;  %v2191_v31 = vpack.c.bf16 %v415_v29, %v391_v28  ;;  %v2229_v26 = vpack.c.bf16 %v464_v20, %v440_v19  ;;  %v510_v28 = vld [vmem:[#allocation13 + $0x3e0] sm:$0xff]  ;;  %v2199_v29 = vpack.c.bf16 %v511_v22, %v487_v21  ;;  %v679_v8 = vld [vmem:[#allocation13 + $0x928] sm:$0xff]  ;;  %v680_v19 = vld [vmem:[#allocation13 + $0x930] sm:$0xff] }
 0x1c8   :  { %v704_v20 = vld [vmem:[#allocation13 + $0x9f0] sm:$0xff]  ;;  %v727_v21 = vld [vmem:[#allocation13 + $0xaa8] sm:$0xff] }
 0x1c9   :  { %2158 = vmatpush1.bf16.msra.mxu0 %v2157_v24  ;;  %v513_v24 = vld [vmem:[#allocation13 + $0x3f8] sm:$0xff]  ;;  %v751_v22 = vld [vmem:[#allocation13 + $0xb68] sm:$0xff] }
 0x1ca   :  { %2174 = vmatpush1.bf16.msra.mxu1 %v2173_v40  ;;  %2192 = vmatprep.subr.bf16.mxu0 %v2191_v31  ;;  %v488_v31 = vld [vmem:[#allocation13 + $0x330] sm:$0xff] }
 0x1cb   :  { %2176 = vmatprep.subr.bf16.mxu1 %v2175_v50 }
 0x1ce   :  { %2178 = vmatpush1.bf16.msra.mxu1 %v2177_v54 }
 0x1cf   :  { %2180 = vmatprep.subr.bf16.mxu1 %v2179_v62 }
 0x1d2   :  { %2182 = vmatpush1.bf16.msra.mxu1 %v2181_v3 }
 0x1d3   :  { %2184 = vmatprep.subr.bf16.mxu1 %v2183_v11 }
 0x1d6   :  { %2186 = vmatpush1.bf16.msra.mxu1 %v2185_v15  ;;  %v462_v15 = vld [vmem:[#allocation13 + $0x260] sm:$0xff] }
 0x1d7   :  { %2188 = vmatprep.subr.bf16.mxu1 %v2187_v23  ;;  %v489_v23 = vld [vmem:[#allocation13 + $0x338] sm:$0xff]  ;;  %v2197_v25 = vpack.c.bf16 %v462_v15, %v438_v14  ;;  %v678_v14 = vld [vmem:[#allocation13 + $0x920] sm:$0xff] }
 0x1d8   :  { %v2231_v30 = vpack.c.bf16 %v513_v24, %v489_v23  ;;  %v702_v15 = vld [vmem:[#allocation13 + $0x9e0] sm:$0xff]  ;;  %v729_v23 = vld [vmem:[#allocation13 + $0xab8] sm:$0xff] }
 0x1d9   :  { %v753_v24 = vld [vmem:[#allocation13 + $0xb78] sm:$0xff] }
 0x1da   :  { %2190 = vmatpush1.bf16.msra.mxu1 %v2189_v27  ;;  %v486_v27 = vld [vmem:[#allocation13 + $0x320] sm:$0xff] }
 0x1db   :  { %2224 = vmatprep.subr.bf16.mxu1 %v2223_v33  ;;  %v535_v33 = vld [vmem:[#allocation13 + $0x4a8] sm:$0xff] }
 0x290   :  { %v343_v34 = vpop.f32.mrb[0].mxu1 }
 0x291   :  { %v348_v35 = vsel %vm347_vm4, %v343_v34, 0.0  ;;  %v2108_v36 = vpop.f32.mrb[1].mxu1 }
 0x292   :  { %v349_v37 = vrot.slane %v348_v35, 4  ;;  %v561_v36 = vld [vmem:[#allocation13 + $0x578] sm:$0xff] }
 0x294   :  { %v350_v38 = vadd.f32 %v349_v37, %v348_v35  ;;  %v537_v35 = vld [vmem:[#allocation13 + $0x4b8] sm:$0xff]  ;;  %v2201_v37 = vpack.c.bf16 %v510_v28, %v486_v27  ;;  %v726_v27 = vld [vmem:[#allocation13 + $0xaa0] sm:$0xff] }
 0x295   :  { %v750_v28 = vld [vmem:[#allocation13 + $0xb60] sm:$0xff] }
 0x296   :  { %v351_v39 = vrot.slane %v350_v38, 2 }
 0x298   :  { %v352_v40 = vadd.f32 %v351_v39, %v350_v38  ;;  %v2233_v38 = vpack.c.bf16 %v512_v32, %v488_v31  ;;  %v534_v39 = vld [vmem:[#allocation13 + $0x4a0] sm:$0xff]  ;;  %v728_v31 = vld [vmem:[#allocation13 + $0xab0] sm:$0xff] }
 0x299   :  { %v752_v32 = vld [vmem:[#allocation13 + $0xb70] sm:$0xff] }
 0x29a   :  { %v353_v41 = vrot.slane %v352_v40, 1 }
 0x29c   :  { %v354_v42 = vadd.f32 %v353_v41, %v352_v40  ;;  %v558_v40 = vld [vmem:[#allocation13 + $0x560] sm:$0xff] }
 0x29e   :  { %v355_v44 = vmul.f32 0.5, %v354_v42  ;;  %v2235_v42 = vpack.c.bf16 %v561_v36, %v537_v35  ;;  %v397_v35 = vld [vmem:[#allocation13 + $0x58] sm:$0xff] }
 0x29f   :  { %v421_v36 = vld [vmem:[#allocation13 + $0x118] sm:$0xff] }
 0x2a0   :  { %v356_v46 = vsub.f32 %v343_v34, %v355_v44 }
 0x2a2   :  { %v357_v47 = vmul.f32 %v356_v46, %v356_v46  ;;  %v560_v46 = vld [vmem:[#allocation13 + $0x570] sm:$0xff] }
 0x2a4   :  { %v358_v48 = vsel %vm347_vm4, %v357_v47, 0.0  ;;  %v583_v47 = vld [vmem:[#allocation13 + $0x628] sm:$0xff] }
 0x2a5   :  { %v359_v49 = vrot.slane %v358_v48, 4 }
 0x2a7   :  { %v360_v50 = vadd.f32 %v359_v49, %v358_v48  ;;  %v607_v48 = vld [vmem:[#allocation13 + $0x6e8] sm:$0xff]  ;;  %v585_v49 = vld [vmem:[#allocation13 + $0x638] sm:$0xff] }
 0x2a9   :  { %v361_v51 = vrot.slane %v360_v50, 2 }
 0x2ab   :  { %v362_v52 = vadd.f32 %v361_v51, %v360_v50  ;;  %v609_v50 = vld [vmem:[#allocation13 + $0x6f8] sm:$0xff]  ;;  %v2205_v51 = vpack.c.bf16 %v558_v40, %v534_v39  ;;  %v394_v39 = vld [vmem:[#allocation13 + $0x40] sm:$0xff] }
 0x2ac   :  { %v418_v40 = vld [vmem:[#allocation13 + $0x100] sm:$0xff] }
 0x2ad   :  { %v363_v53 = vrot.slane %v362_v52, 1 }
 0x2af   :  { %v364_v54 = vadd.f32 %v363_v53, %v362_v52  ;;  %v582_v53 = vld [vmem:[#allocation13 + $0x620] sm:$0xff] }
 0x2b1   :  { %v365_v55 = vmul.f32 0.5, %v364_v54  ;;  %v606_v54 = vld [vmem:[#allocation13 + $0x6e0] sm:$0xff] }
 0x2b3   :  { %v366_v56 = vadd.f32 1e-05, %v365_v55  ;;  %v2207_v55 = vpack.c.bf16 %v607_v48, %v583_v47  ;;  %v443_v47 = vld [vmem:[#allocation13 + $0x1c8] sm:$0xff] }
 0x2b4   :  { %v467_v48 = vld [vmem:[#allocation13 + $0x288] sm:$0xff] }
 0x2b5   :  { %2530 = vrsqrt.f32 %v366_v56  ;;  %v2239_v56 = vpack.c.bf16 %v609_v50, %v585_v49  ;;  %v445_v49 = vld [vmem:[#allocation13 + $0x1d8] sm:$0xff] }
 0x2b6   :  { %v469_v50 = vld [vmem:[#allocation13 + $0x298] sm:$0xff] }
 0x2bf   :  { %v2531_v58 = vpop.eup %2530 }
 0x2c0   :  { %v368_v59 = vmul.f32 %v2531_v58, %v271_v57  ;;  %v584_v57 = vld [vmem:[#allocation13 + $0x630] sm:$0xff] }
 0x2c1   :  { %v608_v58 = vld [vmem:[#allocation13 + $0x6f0] sm:$0xff] }
 0x2c2   :  { %v369_v61 = vmul.f32 %v368_v59, %v355_v44  ;;  %v375_v62 = vrot.slane %v368_v59, %v3023_v45  ;;  %v536_v44 = vld [vmem:[#allocation13 + $0x4b0] sm:$0xff]  ;;  %v631_v59 = vld [vmem:[#allocation13 + $0x7a8] sm:$0xff]  ;;  %v2241_v0 = vpack.c.bf16 %v608_v58, %v584_v57 }
 0x2c3   :  { %v2237_v52 = vpack.c.bf16 %v560_v46, %v536_v44  ;;  %v396_v44 = vld [vmem:[#allocation13 + $0x50] sm:$0xff] }
 0x2c4   :  { %v370_v63 = vsub.f32 %v272_v60, %v369_v61  ;;  %v377_v3 = vmul.f32 %v375_v62, %v343_v34  ;;  %v559_v34 = vld [vmem:[#allocation13 + $0x568] sm:$0xff]  ;;  %v633_v61 = vld [vmem:[#allocation13 + $0x7b8] sm:$0xff]  ;;  %v420_v46 = vld [vmem:[#allocation13 + $0x110] sm:$0xff] }
 0x2c5   :  { %v2203_v41 = vpack.c.bf16 %v559_v34, %v535_v33  ;;  %v655_v60 = vld [vmem:[#allocation13 + $0x868] sm:$0xff]  ;;  %v657_v62 = vld [vmem:[#allocation13 + $0x878] sm:$0xff]  ;;  %v444_v57 = vld [vmem:[#allocation13 + $0x1d0] sm:$0xff] }
 0x2c6   :  { %v382_v4 = vrot.slane %v370_v63, %v3023_v45  ;;  %v2209_v63 = vpack.c.bf16 %v606_v54, %v582_v53  ;;  %v2243_v5 = vpack.c.bf16 %v657_v62, %v633_v61  ;;  %v395_v33 = vld [vmem:[#allocation13 + $0x48] sm:$0xff]  ;;  %v442_v53 = vld [vmem:[#allocation13 + $0x1c0] sm:$0xff]  ;;  %v468_v58 = vld [vmem:[#allocation13 + $0x290] sm:$0xff] }
 0x2c7   :  { %v419_v34 = vld [vmem:[#allocation13 + $0x108] sm:$0xff]  ;;  %v466_v54 = vld [vmem:[#allocation13 + $0x280] sm:$0xff]  ;;  %v493_v61 = vld [vmem:[#allocation13 + $0x358] sm:$0xff] }
 0x2c8   :  { %v384_v11 = vadd.f32 %v382_v4, %v377_v3  ;;  %v654_v3 = vld [vmem:[#allocation13 + $0x860] sm:$0xff]  ;;  %v2211_v4 = vpack.c.bf16 %v655_v60, %v631_v59  ;;  %v491_v59 = vld [vmem:[#allocation13 + $0x348] sm:$0xff]  ;;  %v517_v62 = vld [vmem:[#allocation13 + $0x418] sm:$0xff] }
 0x2c9   :  { %v515_v60 = vld [vmem:[#allocation13 + $0x408] sm:$0xff] }
 0x2ca   :  { %v3030_v16 = vmax.f32 %v384_v11, 0.0  ;;  %v705_v11 = vld [vmem:[#allocation13 + $0x9f8] sm:$0xff] }
 0x2cc   :  { %961 = vmatmul.mubr.f32.vlgmr.msra.gmra.mrb[2].mxu0 %v3030_v16  ;;  %1032 = vmatmul.mubr.f32.vlgmr.msra.gmra.mrb[2].mxu1 %v3030_v16 }
 0x2cd   :  { %2194 = vmatpush1.bf16.msra.mxu0 %v2193_v12  ;;  %2226 = vmatpush1.bf16.msra.mxu1 %v2225_v13  ;;  %v2213_v12 = vpack.c.bf16 %v654_v3, %v630_v2  ;;  %v2245_v13 = vpack.c.bf16 %v656_v7, %v632_v6  ;;  %v490_v2 = vld [vmem:[#allocation13 + $0x340] sm:$0xff]  ;;  %v492_v6 = vld [vmem:[#allocation13 + $0x350] sm:$0xff] }
 0x2ce   :  { %2196 = vmatprep.subr.bf16.mxu0 %v2195_v17  ;;  %2228 = vmatprep.subr.bf16.mxu1 %v2227_v18  ;;  %v2215_v17 = vpack.c.bf16 %v703_v9, %v679_v8  ;;  %v2247_v18 = vpack.c.bf16 %v705_v11, %v681_v10  ;;  %v514_v3 = vld [vmem:[#allocation13 + $0x400] sm:$0xff]  ;;  %v516_v7 = vld [vmem:[#allocation13 + $0x410] sm:$0xff]  ;;  %v539_v8 = vld [vmem:[#allocation13 + $0x4c8] sm:$0xff] }
 0x2cf   :  { %1102 = vmatprep.mubr.f32.mxu0 %v2851_v1  ;;  %1173 = vmatprep.mubr.f32.mxu1 %v2851_v1  ;;  %v563_v9 = vld [vmem:[#allocation13 + $0x588] sm:$0xff]  ;;  %v541_v10 = vld [vmem:[#allocation13 + $0x4d8] sm:$0xff] }
 0x2d0   :  { %v565_v11 = vld [vmem:[#allocation13 + $0x598] sm:$0xff] }
 0x2d1   :  { %2198 = vmatpush1.bf16.msra.mxu0 %v2197_v25  ;;  %2230 = vmatpush1.bf16.msra.mxu1 %v2229_v26  ;;  %v2217_v25 = vpack.c.bf16 %v702_v15, %v678_v14  ;;  %v2249_v26 = vpack.c.bf16 %v704_v20, %v680_v19  ;;  %v538_v14 = vld [vmem:[#allocation13 + $0x4c0] sm:$0xff]  ;;  %v540_v19 = vld [vmem:[#allocation13 + $0x4d0] sm:$0xff] }
 0x2d2   :  { %2200 = vmatprep.subr.bf16.mxu0 %v2199_v29  ;;  %2232 = vmatprep.subr.bf16.mxu1 %v2231_v30  ;;  %v2219_v29 = vpack.c.bf16 %v751_v22, %v727_v21  ;;  %v2251_v30 = vpack.c.bf16 %v753_v24, %v729_v23  ;;  %v562_v15 = vld [vmem:[#allocation13 + $0x580] sm:$0xff]  ;;  %v564_v20 = vld [vmem:[#allocation13 + $0x590] sm:$0xff]  ;;  %v587_v21 = vld [vmem:[#allocation13 + $0x648] sm:$0xff] }
 0x2d3   :  { %v611_v22 = vld [vmem:[#allocation13 + $0x708] sm:$0xff]  ;;  %v589_v23 = vld [vmem:[#allocation13 + $0x658] sm:$0xff] }
 0x2d4   :  { %v613_v24 = vld [vmem:[#allocation13 + $0x718] sm:$0xff] }
 0x2d5   :  { %2202 = vmatpush1.bf16.msra.mxu0 %v2201_v37  ;;  %2234 = vmatpush1.bf16.msra.mxu1 %v2233_v38  ;;  %v2221_v37 = vpack.c.bf16 %v750_v28, %v726_v27  ;;  %v2253_v38 = vpack.c.bf16 %v752_v32, %v728_v31  ;;  %v586_v27 = vld [vmem:[#allocation13 + $0x640] sm:$0xff]  ;;  %v588_v31 = vld [vmem:[#allocation13 + $0x650] sm:$0xff] }
 0x2d6   :  { %2204 = vmatprep.subr.bf16.mxu0 %v2203_v41  ;;  %2236 = vmatprep.subr.bf16.mxu1 %v2235_v42  ;;  %v2255_v41 = vpack.c.bf16 %v419_v34, %v395_v33  ;;  %v2287_v42 = vpack.c.bf16 %v421_v36, %v397_v35  ;;  %v610_v28 = vld [vmem:[#allocation13 + $0x700] sm:$0xff]  ;;  %v612_v32 = vld [vmem:[#allocation13 + $0x710] sm:$0xff]  ;;  %v635_v33 = vld [vmem:[#allocation13 + $0x7c8] sm:$0xff] }
 0x2d7   :  { %v659_v34 = vld [vmem:[#allocation13 + $0x888] sm:$0xff]  ;;  %v637_v35 = vld [vmem:[#allocation13 + $0x7d8] sm:$0xff] }
 0x2d8   :  { %v661_v36 = vld [vmem:[#allocation13 + $0x898] sm:$0xff] }
 0x2d9   :  { %2206 = vmatpush1.bf16.msra.mxu0 %v2205_v51  ;;  %2238 = vmatpush1.bf16.msra.mxu1 %v2237_v52  ;;  %v2257_v51 = vpack.c.bf16 %v418_v40, %v394_v39  ;;  %v2289_v52 = vpack.c.bf16 %v420_v46, %v396_v44  ;;  %v634_v39 = vld [vmem:[#allocation13 + $0x7c0] sm:$0xff]  ;;  %v636_v44 = vld [vmem:[#allocation13 + $0x7d0] sm:$0xff] }
 0x2da   :  { %2208 = vmatprep.subr.bf16.mxu0 %v2207_v55  ;;  %2240 = vmatprep.subr.bf16.mxu1 %v2239_v56  ;;  %v2259_v55 = vpack.c.bf16 %v467_v48, %v443_v47  ;;  %v2291_v56 = vpack.c.bf16 %v469_v50, %v445_v49  ;;  %v658_v40 = vld [vmem:[#allocation13 + $0x880] sm:$0xff]  ;;  %v660_v46 = vld [vmem:[#allocation13 + $0x890] sm:$0xff]  ;;  %v683_v47 = vld [vmem:[#allocation13 + $0x948] sm:$0xff] }
 0x2db   :  { %v707_v48 = vld [vmem:[#allocation13 + $0xa08] sm:$0xff]  ;;  %v685_v49 = vld [vmem:[#allocation13 + $0x958] sm:$0xff] }
 0x2dc   :  { %v709_v50 = vld [vmem:[#allocation13 + $0xa18] sm:$0xff] }
 0x2dd   :  { %2210 = vmatpush1.bf16.msra.mxu0 %v2209_v63  ;;  %2242 = vmatpush1.bf16.msra.mxu1 %v2241_v0  ;;  %v2261_v63 = vpack.c.bf16 %v466_v54, %v442_v53  ;;  %v2293_v0 = vpack.c.bf16 %v468_v58, %v444_v57  ;;  %v682_v53 = vld [vmem:[#allocation13 + $0x940] sm:$0xff]  ;;  %v684_v57 = vld [vmem:[#allocation13 + $0x950] sm:$0xff] }
 0x2de   :  { %2212 = vmatprep.subr.bf16.mxu0 %v2211_v4  ;;  %2244 = vmatprep.subr.bf16.mxu1 %v2243_v5  ;;  %v2263_v4 = vpack.c.bf16 %v515_v60, %v491_v59  ;;  %v2295_v5 = vpack.c.bf16 %v517_v62, %v493_v61  ;;  %v706_v54 = vld [vmem:[#allocation13 + $0xa00] sm:$0xff]  ;;  %v708_v58 = vld [vmem:[#allocation13 + $0xa10] sm:$0xff]  ;;  %v731_v59 = vld [vmem:[#allocation13 + $0xac8] sm:$0xff] }
 0x2df   :  { %v755_v60 = vld [vmem:[#allocation13 + $0xb88] sm:$0xff]  ;;  %v733_v61 = vld [vmem:[#allocation13 + $0xad8] sm:$0xff] }
 0x2e0   :  { %v757_v62 = vld [vmem:[#allocation13 + $0xb98] sm:$0xff] }
 0x2e1   :  { %2214 = vmatpush1.bf16.msra.mxu0 %v2213_v12  ;;  %2246 = vmatpush1.bf16.msra.mxu1 %v2245_v13  ;;  %v2265_v12 = vpack.c.bf16 %v514_v3, %v490_v2  ;;  %v2297_v13 = vpack.c.bf16 %v516_v7, %v492_v6  ;;  %v730_v2 = vld [vmem:[#allocation13 + $0xac0] sm:$0xff]  ;;  %v732_v6 = vld [vmem:[#allocation13 + $0xad0] sm:$0xff] }
 0x2e2   :  { %2216 = vmatprep.subr.bf16.mxu0 %v2215_v17  ;;  %2248 = vmatprep.subr.bf16.mxu1 %v2247_v18  ;;  %v2267_v17 = vpack.c.bf16 %v563_v9, %v539_v8  ;;  %v2299_v18 = vpack.c.bf16 %v565_v11, %v541_v10  ;;  %v754_v3 = vld [vmem:[#allocation13 + $0xb80] sm:$0xff]  ;;  %v756_v7 = vld [vmem:[#allocation13 + $0xb90] sm:$0xff]  ;;  %v399_v8 = vld [vmem:[#allocation13 + $0x68] sm:$0xff] }
 0x2e3   :  { %v423_v9 = vld [vmem:[#allocation13 + $0x128] sm:$0xff]  ;;  %v401_v10 = vld [vmem:[#allocation13 + $0x78] sm:$0xff] }
 0x2e4   :  { %v425_v11 = vld [vmem:[#allocation13 + $0x138] sm:$0xff] }
 0x2e5   :  { %2218 = vmatpush1.bf16.msra.mxu0 %v2217_v25  ;;  %2250 = vmatpush1.bf16.msra.mxu1 %v2249_v26  ;;  %v2269_v25 = vpack.c.bf16 %v562_v15, %v538_v14  ;;  %v2301_v26 = vpack.c.bf16 %v564_v20, %v540_v19  ;;  %v398_v14 = vld [vmem:[#allocation13 + $0x60] sm:$0xff]  ;;  %v400_v19 = vld [vmem:[#allocation13 + $0x70] sm:$0xff] }
 0x2e6   :  { %2220 = vmatprep.subr.bf16.mxu0 %v2219_v29  ;;  %2252 = vmatprep.subr.bf16.mxu1 %v2251_v30  ;;  %v2271_v29 = vpack.c.bf16 %v611_v22, %v587_v21  ;;  %v2303_v30 = vpack.c.bf16 %v613_v24, %v589_v23  ;;  %v422_v15 = vld [vmem:[#allocation13 + $0x120] sm:$0xff]  ;;  %v424_v20 = vld [vmem:[#allocation13 + $0x130] sm:$0xff]  ;;  %v447_v21 = vld [vmem:[#allocation13 + $0x1e8] sm:$0xff] }
 0x2e7   :  { %v471_v22 = vld [vmem:[#allocation13 + $0x2a8] sm:$0xff]  ;;  %v449_v23 = vld [vmem:[#allocation13 + $0x1f8] sm:$0xff] }
 0x2e8   :  { %v473_v24 = vld [vmem:[#allocation13 + $0x2b8] sm:$0xff] }
 0x2e9   :  { %2222 = vmatpush1.bf16.msra.mxu0 %v2221_v37  ;;  %2254 = vmatpush1.bf16.msra.mxu1 %v2253_v38  ;;  %v2273_v37 = vpack.c.bf16 %v610_v28, %v586_v27  ;;  %v2305_v38 = vpack.c.bf16 %v612_v32, %v588_v31  ;;  %v446_v27 = vld [vmem:[#allocation13 + $0x1e0] sm:$0xff]  ;;  %v448_v31 = vld [vmem:[#allocation13 + $0x1f0] sm:$0xff] }
 0x2ea   :  { %2256 = vmatprep.subr.bf16.mxu0 %v2255_v41  ;;  %2288 = vmatprep.subr.bf16.mxu1 %v2287_v42  ;;  %v2275_v41 = vpack.c.bf16 %v659_v34, %v635_v33  ;;  %v2307_v42 = vpack.c.bf16 %v661_v36, %v637_v35  ;;  %v470_v28 = vld [vmem:[#allocation13 + $0x2a0] sm:$0xff]  ;;  %v472_v32 = vld [vmem:[#allocation13 + $0x2b0] sm:$0xff]  ;;  %v495_v33 = vld [vmem:[#allocation13 + $0x368] sm:$0xff] }
 0x2eb   :  { %v519_v34 = vld [vmem:[#allocation13 + $0x428] sm:$0xff]  ;;  %v497_v35 = vld [vmem:[#allocation13 + $0x378] sm:$0xff] }
 0x2ec   :  { %1103 = vmatmul.mubr.f32.vlgmr.msra.gmra.mrb[4].mxu0 %v3030_v16  ;;  %1174 = vmatmul.mubr.f32.vlgmr.msra.gmra.mrb[4].mxu1 %v3030_v16  ;;  %v521_v36 = vld [vmem:[#allocation13 + $0x438] sm:$0xff] }
 0x2ed   :  { %2258 = vmatpush1.bf16.msra.mxu0 %v2257_v51  ;;  %2290 = vmatpush1.bf16.msra.mxu1 %v2289_v52  ;;  %v2277_v51 = vpack.c.bf16 %v658_v40, %v634_v39  ;;  %v2309_v52 = vpack.c.bf16 %v660_v46, %v636_v44  ;;  %v494_v39 = vld [vmem:[#allocation13 + $0x360] sm:$0xff]  ;;  %v496_v44 = vld [vmem:[#allocation13 + $0x370] sm:$0xff] }
 0x2ee   :  { %2260 = vmatprep.subr.bf16.mxu0 %v2259_v55  ;;  %2292 = vmatprep.subr.bf16.mxu1 %v2291_v56  ;;  %v2279_v55 = vpack.c.bf16 %v707_v48, %v683_v47  ;;  %v2311_v56 = vpack.c.bf16 %v709_v50, %v685_v49  ;;  %v518_v40 = vld [vmem:[#allocation13 + $0x420] sm:$0xff]  ;;  %v520_v46 = vld [vmem:[#allocation13 + $0x430] sm:$0xff]  ;;  %v543_v47 = vld [vmem:[#allocation13 + $0x4e8] sm:$0xff] }
 0x2ef   :  { %1244 = vmatprep.mubr.f32.mxu0 %v2851_v1  ;;  %1315 = vmatprep.mubr.f32.mxu1 %v2851_v1  ;;  %v567_v48 = vld [vmem:[#allocation13 + $0x5a8] sm:$0xff]  ;;  %v545_v49 = vld [vmem:[#allocation13 + $0x4f8] sm:$0xff] }
 0x2f0   :  { %v569_v50 = vld [vmem:[#allocation13 + $0x5b8] sm:$0xff] }
 0x2f1   :  { %2262 = vmatpush1.bf16.msra.mxu0 %v2261_v63  ;;  %2294 = vmatpush1.bf16.msra.mxu1 %v2293_v0  ;;  %v2281_v63 = vpack.c.bf16 %v706_v54, %v682_v53  ;;  %v2313_v0 = vpack.c.bf16 %v708_v58, %v684_v57  ;;  %v542_v53 = vld [vmem:[#allocation13 + $0x4e0] sm:$0xff]  ;;  %v544_v57 = vld [vmem:[#allocation13 + $0x4f0] sm:$0xff] }
 0x2f2   :  { %2264 = vmatprep.subr.bf16.mxu0 %v2263_v4  ;;  %2296 = vmatprep.subr.bf16.mxu1 %v2295_v5  ;;  %v2283_v4 = vpack.c.bf16 %v755_v60, %v731_v59  ;;  %v2315_v5 = vpack.c.bf16 %v757_v62, %v733_v61  ;;  %v566_v54 = vld [vmem:[#allocation13 + $0x5a0] sm:$0xff]  ;;  %v568_v58 = vld [vmem:[#allocation13 + $0x5b0] sm:$0xff]  ;;  %v591_v59 = vld [vmem:[#allocation13 + $0x668] sm:$0xff] }
 0x2f3   :  { %v615_v60 = vld [vmem:[#allocation13 + $0x728] sm:$0xff]  ;;  %v593_v61 = vld [vmem:[#allocation13 + $0x678] sm:$0xff] }
 0x2f4   :  { %v617_v62 = vld [vmem:[#allocation13 + $0x738] sm:$0xff] }
 0x2f5   :  { %2266 = vmatpush1.bf16.msra.mxu0 %v2265_v12  ;;  %2298 = vmatpush1.bf16.msra.mxu1 %v2297_v13  ;;  %v2285_v12 = vpack.c.bf16 %v754_v3, %v730_v2  ;;  %v2317_v13 = vpack.c.bf16 %v756_v7, %v732_v6  ;;  %v590_v2 = vld [vmem:[#allocation13 + $0x660] sm:$0xff]  ;;  %v592_v6 = vld [vmem:[#allocation13 + $0x670] sm:$0xff] }
 0x2f6   :  { %2268 = vmatprep.subr.bf16.mxu0 %v2267_v17  ;;  %2300 = vmatprep.subr.bf16.mxu1 %v2299_v18  ;;  %v2319_v17 = vpack.c.bf16 %v423_v9, %v399_v8  ;;  %v2351_v18 = vpack.c.bf16 %v425_v11, %v401_v10  ;;  %v614_v3 = vld [vmem:[#allocation13 + $0x720] sm:$0xff]  ;;  %v616_v7 = vld [vmem:[#allocation13 + $0x730] sm:$0xff]  ;;  %v639_v8 = vld [vmem:[#allocation13 + $0x7e8] sm:$0xff] }
 0x2f7   :  { %v663_v9 = vld [vmem:[#allocation13 + $0x8a8] sm:$0xff]  ;;  %v641_v10 = vld [vmem:[#allocation13 + $0x7f8] sm:$0xff] }
 0x2f8   :  { %v665_v11 = vld [vmem:[#allocation13 + $0x8b8] sm:$0xff] }
 0x2f9   :  { %2270 = vmatpush1.bf16.msra.mxu0 %v2269_v25  ;;  %2302 = vmatpush1.bf16.msra.mxu1 %v2301_v26  ;;  %v2321_v25 = vpack.c.bf16 %v422_v15, %v398_v14  ;;  %v2353_v26 = vpack.c.bf16 %v424_v20, %v400_v19  ;;  %v638_v14 = vld [vmem:[#allocation13 + $0x7e0] sm:$0xff]  ;;  %v640_v19 = vld [vmem:[#allocation13 + $0x7f0] sm:$0xff] }
 0x2fa   :  { %2272 = vmatprep.subr.bf16.mxu0 %v2271_v29  ;;  %2304 = vmatprep.subr.bf16.mxu1 %v2303_v30  ;;  %v2323_v29 = vpack.c.bf16 %v471_v22, %v447_v21  ;;  %v2355_v30 = vpack.c.bf16 %v473_v24, %v449_v23  ;;  %v662_v15 = vld [vmem:[#allocation13 + $0x8a0] sm:$0xff]  ;;  %v664_v20 = vld [vmem:[#allocation13 + $0x8b0] sm:$0xff]  ;;  %v687_v21 = vld [vmem:[#allocation13 + $0x968] sm:$0xff] }
 0x2fb   :  { %v711_v22 = vld [vmem:[#allocation13 + $0xa28] sm:$0xff]  ;;  %v689_v23 = vld [vmem:[#allocation13 + $0x978] sm:$0xff] }
 0x2fc   :  { %v713_v24 = vld [vmem:[#allocation13 + $0xa38] sm:$0xff] }
 0x2fd   :  { %2274 = vmatpush1.bf16.msra.mxu0 %v2273_v37  ;;  %2306 = vmatpush1.bf16.msra.mxu1 %v2305_v38  ;;  %v2325_v37 = vpack.c.bf16 %v470_v28, %v446_v27  ;;  %v2357_v38 = vpack.c.bf16 %v472_v32, %v448_v31  ;;  %v686_v27 = vld [vmem:[#allocation13 + $0x960] sm:$0xff]  ;;  %v688_v31 = vld [vmem:[#allocation13 + $0x970] sm:$0xff] }
 0x2fe   :  { %2276 = vmatprep.subr.bf16.mxu0 %v2275_v41  ;;  %2308 = vmatprep.subr.bf16.mxu1 %v2307_v42  ;;  %v2327_v41 = vpack.c.bf16 %v519_v34, %v495_v33  ;;  %v2359_v42 = vpack.c.bf16 %v521_v36, %v497_v35  ;;  %v710_v28 = vld [vmem:[#allocation13 + $0xa20] sm:$0xff]  ;;  %v712_v32 = vld [vmem:[#allocation13 + $0xa30] sm:$0xff]  ;;  %v735_v33 = vld [vmem:[#allocation13 + $0xae8] sm:$0xff] }
 0x2ff   :  { %v759_v34 = vld [vmem:[#allocation13 + $0xba8] sm:$0xff]  ;;  %v737_v35 = vld [vmem:[#allocation13 + $0xaf8] sm:$0xff] }
 0x300   :  { %v761_v36 = vld [vmem:[#allocation13 + $0xbb8] sm:$0xff] }
 0x301   :  { %2278 = vmatpush1.bf16.msra.mxu0 %v2277_v51  ;;  %2310 = vmatpush1.bf16.msra.mxu1 %v2309_v52  ;;  %v2329_v51 = vpack.c.bf16 %v518_v40, %v494_v39  ;;  %v2361_v52 = vpack.c.bf16 %v520_v46, %v496_v44  ;;  %v734_v39 = vld [vmem:[#allocation13 + $0xae0] sm:$0xff]  ;;  %v736_v44 = vld [vmem:[#allocation13 + $0xaf0] sm:$0xff] }
 0x302   :  { %2280 = vmatprep.subr.bf16.mxu0 %v2279_v55  ;;  %2312 = vmatprep.subr.bf16.mxu1 %v2311_v56  ;;  %v2331_v55 = vpack.c.bf16 %v567_v48, %v543_v47  ;;  %v2363_v56 = vpack.c.bf16 %v569_v50, %v545_v49  ;;  %v758_v40 = vld [vmem:[#allocation13 + $0xba0] sm:$0xff]  ;;  %v760_v46 = vld [vmem:[#allocation13 + $0xbb0] sm:$0xff]  ;;  %v403_v47 = vld [vmem:[#allocation13 + $0x88] sm:$0xff] }
 0x303   :  { %v427_v48 = vld [vmem:[#allocation13 + $0x148] sm:$0xff]  ;;  %v405_v49 = vld [vmem:[#allocation13 + $0x98] sm:$0xff] }
 0x304   :  { %v429_v50 = vld [vmem:[#allocation13 + $0x158] sm:$0xff] }
 0x305   :  { %2282 = vmatpush1.bf16.msra.mxu0 %v2281_v63  ;;  %2314 = vmatpush1.bf16.msra.mxu1 %v2313_v0  ;;  %v2333_v63 = vpack.c.bf16 %v566_v54, %v542_v53  ;;  %v2365_v0 = vpack.c.bf16 %v568_v58, %v544_v57  ;;  %v402_v53 = vld [vmem:[#allocation13 + $0x80] sm:$0xff]  ;;  %v404_v57 = vld [vmem:[#allocation13 + $0x90] sm:$0xff] }
 0x306   :  { %2284 = vmatprep.subr.bf16.mxu0 %v2283_v4  ;;  %2316 = vmatprep.subr.bf16.mxu1 %v2315_v5  ;;  %v2335_v4 = vpack.c.bf16 %v615_v60, %v591_v59  ;;  %v2367_v5 = vpack.c.bf16 %v617_v62, %v593_v61  ;;  %v426_v54 = vld [vmem:[#allocation13 + $0x140] sm:$0xff]  ;;  %v428_v58 = vld [vmem:[#allocation13 + $0x150] sm:$0xff]  ;;  %v451_v59 = vld [vmem:[#allocation13 + $0x208] sm:$0xff] }
 0x307   :  { %v475_v60 = vld [vmem:[#allocation13 + $0x2c8] sm:$0xff]  ;;  %v453_v61 = vld [vmem:[#allocation13 + $0x218] sm:$0xff] }
 0x308   :  { %v477_v62 = vld [vmem:[#allocation13 + $0x2d8] sm:$0xff] }
 0x309   :  { %2286 = vmatpush1.bf16.msra.mxu0 %v2285_v12  ;;  %2318 = vmatpush1.bf16.msra.mxu1 %v2317_v13  ;;  %v2337_v12 = vpack.c.bf16 %v614_v3, %v590_v2  ;;  %v2369_v13 = vpack.c.bf16 %v616_v7, %v592_v6  ;;  %v450_v2 = vld [vmem:[#allocation13 + $0x200] sm:$0xff]  ;;  %v452_v6 = vld [vmem:[#allocation13 + $0x210] sm:$0xff] }
 0x30a   :  { %2320 = vmatprep.subr.bf16.mxu0 %v2319_v17  ;;  %2352 = vmatprep.subr.bf16.mxu1 %v2351_v18  ;;  %v2339_v17 = vpack.c.bf16 %v663_v9, %v639_v8  ;;  %v2371_v18 = vpack.c.bf16 %v665_v11, %v641_v10  ;;  %v474_v3 = vld [vmem:[#allocation13 + $0x2c0] sm:$0xff]  ;;  %v476_v7 = vld [vmem:[#allocation13 + $0x2d0] sm:$0xff]  ;;  %v499_v8 = vld [vmem:[#allocation13 + $0x388] sm:$0xff] }
 0x30b   :  { %v523_v9 = vld [vmem:[#allocation13 + $0x448] sm:$0xff]  ;;  %v501_v10 = vld [vmem:[#allocation13 + $0x398] sm:$0xff] }
 0x30c   :  { %1245 = vmatmul.mubr.f32.vlgmr.msra.gmra.mrb[6].mxu0 %v3030_v16  ;;  %1316 = vmatmul.mubr.f32.vlgmr.msra.gmra.mrb[6].mxu1 %v3030_v16  ;;  %v525_v11 = vld [vmem:[#allocation13 + $0x458] sm:$0xff] }
 0x30d   :  { %2322 = vmatpush1.bf16.msra.mxu0 %v2321_v25  ;;  %2354 = vmatpush1.bf16.msra.mxu1 %v2353_v26  ;;  %v2341_v25 = vpack.c.bf16 %v662_v15, %v638_v14  ;;  %v2373_v26 = vpack.c.bf16 %v664_v20, %v640_v19  ;;  %v498_v14 = vld [vmem:[#allocation13 + $0x380] sm:$0xff]  ;;  %v500_v19 = vld [vmem:[#allocation13 + $0x390] sm:$0xff] }
 0x30e   :  { %2324 = vmatprep.subr.bf16.mxu0 %v2323_v29  ;;  %2356 = vmatprep.subr.bf16.mxu1 %v2355_v30  ;;  %v2343_v29 = vpack.c.bf16 %v711_v22, %v687_v21  ;;  %v2375_v30 = vpack.c.bf16 %v713_v24, %v689_v23  ;;  %v522_v15 = vld [vmem:[#allocation13 + $0x440] sm:$0xff]  ;;  %v524_v20 = vld [vmem:[#allocation13 + $0x450] sm:$0xff]  ;;  %v547_v21 = vld [vmem:[#allocation13 + $0x508] sm:$0xff] }
 0x30f   :  { %1386 = vmatprep.mubr.f32.mxu0 %v2851_v1  ;;  %1457 = vmatprep.mubr.f32.mxu1 %v2851_v1  ;;  %v571_v22 = vld [vmem:[#allocation13 + $0x5c8] sm:$0xff]  ;;  %v549_v23 = vld [vmem:[#allocation13 + $0x518] sm:$0xff] }
 0x310   :  { %v573_v24 = vld [vmem:[#allocation13 + $0x5d8] sm:$0xff] }
 0x311   :  { %2326 = vmatpush1.bf16.msra.mxu0 %v2325_v37  ;;  %2358 = vmatpush1.bf16.msra.mxu1 %v2357_v38  ;;  %v2345_v37 = vpack.c.bf16 %v710_v28, %v686_v27  ;;  %v2377_v38 = vpack.c.bf16 %v712_v32, %v688_v31  ;;  %v546_v27 = vld [vmem:[#allocation13 + $0x500] sm:$0xff]  ;;  %v548_v31 = vld [vmem:[#allocation13 + $0x510] sm:$0xff] }
 0x312   :  { %2328 = vmatprep.subr.bf16.mxu0 %v2327_v41  ;;  %2360 = vmatprep.subr.bf16.mxu1 %v2359_v42  ;;  %v2347_v41 = vpack.c.bf16 %v759_v34, %v735_v33  ;;  %v2379_v42 = vpack.c.bf16 %v761_v36, %v737_v35  ;;  %v570_v28 = vld [vmem:[#allocation13 + $0x5c0] sm:$0xff]  ;;  %v572_v32 = vld [vmem:[#allocation13 + $0x5d0] sm:$0xff]  ;;  %v595_v33 = vld [vmem:[#allocation13 + $0x688] sm:$0xff] }
 0x313   :  { %v619_v34 = vld [vmem:[#allocation13 + $0x748] sm:$0xff]  ;;  %v597_v35 = vld [vmem:[#allocation13 + $0x698] sm:$0xff] }
 0x314   :  { %v621_v36 = vld [vmem:[#allocation13 + $0x758] sm:$0xff] }
 0x315   :  { %2330 = vmatpush1.bf16.msra.mxu0 %v2329_v51  ;;  %2362 = vmatpush1.bf16.msra.mxu1 %v2361_v52  ;;  %v2349_v51 = vpack.c.bf16 %v758_v40, %v734_v39  ;;  %v2381_v52 = vpack.c.bf16 %v760_v46, %v736_v44  ;;  %v594_v39 = vld [vmem:[#allocation13 + $0x680] sm:$0xff]  ;;  %v596_v44 = vld [vmem:[#allocation13 + $0x690] sm:$0xff] }
 0x316   :  { %2332 = vmatprep.subr.bf16.mxu0 %v2331_v55  ;;  %2364 = vmatprep.subr.bf16.mxu1 %v2363_v56  ;;  %v2383_v55 = vpack.c.bf16 %v427_v48, %v403_v47  ;;  %v2415_v56 = vpack.c.bf16 %v429_v50, %v405_v49  ;;  %v618_v40 = vld [vmem:[#allocation13 + $0x740] sm:$0xff]  ;;  %v620_v46 = vld [vmem:[#allocation13 + $0x750] sm:$0xff]  ;;  %v643_v47 = vld [vmem:[#allocation13 + $0x808] sm:$0xff] }
 0x317   :  { %v667_v48 = vld [vmem:[#allocation13 + $0x8c8] sm:$0xff]  ;;  %v645_v49 = vld [vmem:[#allocation13 + $0x818] sm:$0xff] }
 0x318   :  { %v669_v50 = vld [vmem:[#allocation13 + $0x8d8] sm:$0xff] }
 0x319   :  { %2334 = vmatpush1.bf16.msra.mxu0 %v2333_v63  ;;  %2366 = vmatpush1.bf16.msra.mxu1 %v2365_v0  ;;  %v2385_v63 = vpack.c.bf16 %v426_v54, %v402_v53  ;;  %v2417_v0 = vpack.c.bf16 %v428_v58, %v404_v57  ;;  %v642_v53 = vld [vmem:[#allocation13 + $0x800] sm:$0xff]  ;;  %v644_v57 = vld [vmem:[#allocation13 + $0x810] sm:$0xff] }
 0x31a   :  { %2336 = vmatprep.subr.bf16.mxu0 %v2335_v4  ;;  %2368 = vmatprep.subr.bf16.mxu1 %v2367_v5  ;;  %v2387_v4 = vpack.c.bf16 %v475_v60, %v451_v59  ;;  %v2419_v5 = vpack.c.bf16 %v477_v62, %v453_v61  ;;  %v666_v54 = vld [vmem:[#allocation13 + $0x8c0] sm:$0xff]  ;;  %v668_v58 = vld [vmem:[#allocation13 + $0x8d0] sm:$0xff]  ;;  %v691_v59 = vld [vmem:[#allocation13 + $0x988] sm:$0xff] }
 0x31b   :  { %v715_v60 = vld [vmem:[#allocation13 + $0xa48] sm:$0xff]  ;;  %v693_v61 = vld [vmem:[#allocation13 + $0x998] sm:$0xff] }
 0x31c   :  { %v717_v62 = vld [vmem:[#allocation13 + $0xa58] sm:$0xff] }
 0x31d   :  { %2338 = vmatpush1.bf16.msra.mxu0 %v2337_v12  ;;  %2370 = vmatpush1.bf16.msra.mxu1 %v2369_v13  ;;  %v2389_v12 = vpack.c.bf16 %v474_v3, %v450_v2  ;;  %v2421_v13 = vpack.c.bf16 %v476_v7, %v452_v6  ;;  %v690_v2 = vld [vmem:[#allocation13 + $0x980] sm:$0xff]  ;;  %v692_v6 = vld [vmem:[#allocation13 + $0x990] sm:$0xff] }
 0x31e   :  { %2340 = vmatprep.subr.bf16.mxu0 %v2339_v17  ;;  %2372 = vmatprep.subr.bf16.mxu1 %v2371_v18  ;;  %v2391_v17 = vpack.c.bf16 %v523_v9, %v499_v8  ;;  %v2423_v18 = vpack.c.bf16 %v525_v11, %v501_v10  ;;  %v714_v3 = vld [vmem:[#allocation13 + $0xa40] sm:$0xff]  ;;  %v716_v7 = vld [vmem:[#allocation13 + $0xa50] sm:$0xff]  ;;  %v739_v8 = vld [vmem:[#allocation13 + $0xb08] sm:$0xff] }
 0x31f   :  { %v763_v9 = vld [vmem:[#allocation13 + $0xbc8] sm:$0xff]  ;;  %v741_v10 = vld [vmem:[#allocation13 + $0xb18] sm:$0xff] }
 0x320   :  { %v765_v11 = vld [vmem:[#allocation13 + $0xbd8] sm:$0xff] }
 0x321   :  { %2342 = vmatpush1.bf16.msra.mxu0 %v2341_v25  ;;  %2374 = vmatpush1.bf16.msra.mxu1 %v2373_v26  ;;  %v2393_v25 = vpack.c.bf16 %v522_v15, %v498_v14  ;;  %v2425_v26 = vpack.c.bf16 %v524_v20, %v500_v19  ;;  %v738_v14 = vld [vmem:[#allocation13 + $0xb00] sm:$0xff]  ;;  %v740_v19 = vld [vmem:[#allocation13 + $0xb10] sm:$0xff] }
 0x322   :  { %2344 = vmatprep.subr.bf16.mxu0 %v2343_v29  ;;  %2376 = vmatprep.subr.bf16.mxu1 %v2375_v30  ;;  %v2395_v29 = vpack.c.bf16 %v571_v22, %v547_v21  ;;  %v2427_v30 = vpack.c.bf16 %v573_v24, %v549_v23  ;;  %v762_v15 = vld [vmem:[#allocation13 + $0xbc0] sm:$0xff]  ;;  %v764_v20 = vld [vmem:[#allocation13 + $0xbd0] sm:$0xff]  ;;  %v407_v21 = vld [vmem:[#allocation13 + $0xa8] sm:$0xff] }
 0x323   :  { %v431_v22 = vld [vmem:[#allocation13 + $0x168] sm:$0xff]  ;;  %v409_v23 = vld [vmem:[#allocation13 + $0xb8] sm:$0xff] }
 0x324   :  { %v433_v24 = vld [vmem:[#allocation13 + $0x178] sm:$0xff] }
 0x325   :  { %2346 = vmatpush1.bf16.msra.mxu0 %v2345_v37  ;;  %2378 = vmatpush1.bf16.msra.mxu1 %v2377_v38  ;;  %v2397_v37 = vpack.c.bf16 %v570_v28, %v546_v27  ;;  %v2429_v38 = vpack.c.bf16 %v572_v32, %v548_v31  ;;  %v406_v27 = vld [vmem:[#allocation13 + $0xa0] sm:$0xff]  ;;  %v408_v31 = vld [vmem:[#allocation13 + $0xb0] sm:$0xff] }
 0x326   :  { %2348 = vmatprep.subr.bf16.mxu0 %v2347_v41  ;;  %2380 = vmatprep.subr.bf16.mxu1 %v2379_v42  ;;  %v2399_v41 = vpack.c.bf16 %v619_v34, %v595_v33  ;;  %v2431_v42 = vpack.c.bf16 %v621_v36, %v597_v35  ;;  %v430_v28 = vld [vmem:[#allocation13 + $0x160] sm:$0xff]  ;;  %v432_v32 = vld [vmem:[#allocation13 + $0x170] sm:$0xff]  ;;  %v455_v33 = vld [vmem:[#allocation13 + $0x228] sm:$0xff] }
 0x327   :  { %v479_v34 = vld [vmem:[#allocation13 + $0x2e8] sm:$0xff]  ;;  %v457_v35 = vld [vmem:[#allocation13 + $0x238] sm:$0xff] }
 0x328   :  { %v481_v36 = vld [vmem:[#allocation13 + $0x2f8] sm:$0xff] }
 0x329   :  { %2350 = vmatpush1.bf16.msra.mxu0 %v2349_v51  ;;  %2382 = vmatpush1.bf16.msra.mxu1 %v2381_v52  ;;  %v2401_v51 = vpack.c.bf16 %v618_v40, %v594_v39  ;;  %v2433_v52 = vpack.c.bf16 %v620_v46, %v596_v44  ;;  %v454_v39 = vld [vmem:[#allocation13 + $0x220] sm:$0xff]  ;;  %v456_v44 = vld [vmem:[#allocation13 + $0x230] sm:$0xff] }
 0x32a   :  { %2384 = vmatprep.subr.bf16.mxu0 %v2383_v55  ;;  %2416 = vmatprep.subr.bf16.mxu1 %v2415_v56  ;;  %v2403_v55 = vpack.c.bf16 %v667_v48, %v643_v47  ;;  %v2435_v56 = vpack.c.bf16 %v669_v50, %v645_v49  ;;  %v478_v40 = vld [vmem:[#allocation13 + $0x2e0] sm:$0xff]  ;;  %v480_v46 = vld [vmem:[#allocation13 + $0x2f0] sm:$0xff]  ;;  %v503_v47 = vld [vmem:[#allocation13 + $0x3a8] sm:$0xff] }
 0x32b   :  { %v527_v48 = vld [vmem:[#allocation13 + $0x468] sm:$0xff]  ;;  %v505_v49 = vld [vmem:[#allocation13 + $0x3b8] sm:$0xff] }
 0x32c   :  { %1387 = vmatmul.mubr.f32.vlgmr.msra.gmra.mrb[8].mxu0 %v3030_v16  ;;  %1458 = vmatmul.mubr.f32.vlgmr.msra.gmra.mrb[8].mxu1 %v3030_v16  ;;  %v529_v50 = vld [vmem:[#allocation13 + $0x478] sm:$0xff] }
 0x32d   :  { %2386 = vmatpush1.bf16.msra.mxu0 %v2385_v63  ;;  %2418 = vmatpush1.bf16.msra.mxu1 %v2417_v0  ;;  %v2405_v63 = vpack.c.bf16 %v666_v54, %v642_v53  ;;  %v2437_v0 = vpack.c.bf16 %v668_v58, %v644_v57  ;;  %v502_v53 = vld [vmem:[#allocation13 + $0x3a0] sm:$0xff]  ;;  %v504_v57 = vld [vmem:[#allocation13 + $0x3b0] sm:$0xff] }
 0x32e   :  { %2388 = vmatprep.subr.bf16.mxu0 %v2387_v4  ;;  %2420 = vmatprep.subr.bf16.mxu1 %v2419_v5  ;;  %v2407_v4 = vpack.c.bf16 %v715_v60, %v691_v59  ;;  %v2439_v5 = vpack.c.bf16 %v717_v62, %v693_v61  ;;  %v526_v54 = vld [vmem:[#allocation13 + $0x460] sm:$0xff]  ;;  %v528_v58 = vld [vmem:[#allocation13 + $0x470] sm:$0xff]  ;;  %v551_v59 = vld [vmem:[#allocation13 + $0x528] sm:$0xff] }
 0x32f   :  { %1528 = vmatprep.mubr.f32.mxu0 %v2851_v1  ;;  %1599 = vmatprep.mubr.f32.mxu1 %v2851_v1  ;;  %v575_v60 = vld [vmem:[#allocation13 + $0x5e8] sm:$0xff]  ;;  %v553_v61 = vld [vmem:[#allocation13 + $0x538] sm:$0xff] }
 0x330   :  { %v577_v62 = vld [vmem:[#allocation13 + $0x5f8] sm:$0xff] }
 0x331   :  { %2390 = vmatpush1.bf16.msra.mxu0 %v2389_v12  ;;  %2422 = vmatpush1.bf16.msra.mxu1 %v2421_v13  ;;  %v2409_v12 = vpack.c.bf16 %v714_v3, %v690_v2  ;;  %v2441_v13 = vpack.c.bf16 %v716_v7, %v692_v6  ;;  %v550_v2 = vld [vmem:[#allocation13 + $0x520] sm:$0xff]  ;;  %v552_v6 = vld [vmem:[#allocation13 + $0x530] sm:$0xff] }
 0x332   :  { %2392 = vmatprep.subr.bf16.mxu0 %v2391_v17  ;;  %2424 = vmatprep.subr.bf16.mxu1 %v2423_v18  ;;  %v2411_v17 = vpack.c.bf16 %v763_v9, %v739_v8  ;;  %v2443_v18 = vpack.c.bf16 %v765_v11, %v741_v10  ;;  %v574_v3 = vld [vmem:[#allocation13 + $0x5e0] sm:$0xff]  ;;  %v576_v7 = vld [vmem:[#allocation13 + $0x5f0] sm:$0xff]  ;;  %v599_v8 = vld [vmem:[#allocation13 + $0x6a8] sm:$0xff] }
 0x333   :  { %v623_v9 = vld [vmem:[#allocation13 + $0x768] sm:$0xff]  ;;  %v601_v10 = vld [vmem:[#allocation13 + $0x6b8] sm:$0xff] }
 0x334   :  { %v625_v11 = vld [vmem:[#allocation13 + $0x778] sm:$0xff] }
 0x335   :  { %2394 = vmatpush1.bf16.msra.mxu0 %v2393_v25  ;;  %2426 = vmatpush1.bf16.msra.mxu1 %v2425_v26  ;;  %v2413_v25 = vpack.c.bf16 %v762_v15, %v738_v14  ;;  %v2445_v26 = vpack.c.bf16 %v764_v20, %v740_v19  ;;  %v622_v14 = vld [vmem:[#allocation13 + $0x760] sm:$0xff]  ;;  %v2463_v15 = vpack.c.bf16 %v623_v9, %v599_v8  ;;  %v624_v19 = vld [vmem:[#allocation13 + $0x770] sm:$0xff]  ;;  %v647_v20 = vld [vmem:[#allocation13 + $0x828] sm:$0xff] }
 0x336   :  { %2396 = vmatprep.subr.bf16.mxu0 %v2395_v29  ;;  %2428 = vmatprep.subr.bf16.mxu1 %v2427_v30  ;;  %v2447_v29 = vpack.c.bf16 %v431_v22, %v407_v21  ;;  %v2479_v30 = vpack.c.bf16 %v433_v24, %v409_v23  ;;  %v671_v21 = vld [vmem:[#allocation13 + $0x8e8] sm:$0xff]  ;;  %v649_v22 = vld [vmem:[#allocation13 + $0x838] sm:$0xff] }
 0x337   :  { %v673_v23 = vld [vmem:[#allocation13 + $0x8f8] sm:$0xff] }
 0x339   :  { %2398 = vmatpush1.bf16.msra.mxu0 %v2397_v37  ;;  %2430 = vmatpush1.bf16.msra.mxu1 %v2429_v38  ;;  %v2449_v37 = vpack.c.bf16 %v430_v28, %v406_v27  ;;  %v2481_v38 = vpack.c.bf16 %v432_v32, %v408_v31  ;;  %v670_v27 = vld [vmem:[#allocation13 + $0x8e0] sm:$0xff]  ;;  %v2467_v28 = vpack.c.bf16 %v671_v21, %v647_v20  ;;  %v672_v31 = vld [vmem:[#allocation13 + $0x8f0] sm:$0xff]  ;;  %v695_v32 = vld [vmem:[#allocation13 + $0x9a8] sm:$0xff] }
 0x33a   :  { %2400 = vmatprep.subr.bf16.mxu0 %v2399_v41  ;;  %2432 = vmatprep.subr.bf16.mxu1 %v2431_v42  ;;  %v2451_v41 = vpack.c.bf16 %v479_v34, %v455_v33  ;;  %v2483_v42 = vpack.c.bf16 %v481_v36, %v457_v35  ;;  %v719_v33 = vld [vmem:[#allocation13 + $0xa68] sm:$0xff]  ;;  %v697_v34 = vld [vmem:[#allocation13 + $0x9b8] sm:$0xff] }
 0x33b   :  { %v721_v35 = vld [vmem:[#allocation13 + $0xa78] sm:$0xff] }
 0x33d   :  { %2402 = vmatpush1.bf16.msra.mxu0 %v2401_v51  ;;  %2434 = vmatpush1.bf16.msra.mxu1 %v2433_v52  ;;  %v2453_v51 = vpack.c.bf16 %v478_v40, %v454_v39  ;;  %v2485_v52 = vpack.c.bf16 %v480_v46, %v456_v44  ;;  %v718_v39 = vld [vmem:[#allocation13 + $0xa60] sm:$0xff]  ;;  %v2471_v40 = vpack.c.bf16 %v719_v33, %v695_v32  ;;  %v720_v44 = vld [vmem:[#allocation13 + $0xa70] sm:$0xff]  ;;  %v743_v46 = vld [vmem:[#allocation13 + $0xb28] sm:$0xff] }
 0x33e   :  { %2404 = vmatprep.subr.bf16.mxu0 %v2403_v55  ;;  %2436 = vmatprep.subr.bf16.mxu1 %v2435_v56  ;;  %v2455_v55 = vpack.c.bf16 %v527_v48, %v503_v47  ;;  %v2487_v56 = vpack.c.bf16 %v529_v50, %v505_v49  ;;  %v767_v47 = vld [vmem:[#allocation13 + $0xbe8] sm:$0xff]  ;;  %v745_v48 = vld [vmem:[#allocation13 + $0xb38] sm:$0xff] }
 0x33f   :  { %v769_v49 = vld [vmem:[#allocation13 + $0xbf8] sm:$0xff] }
 0x341   :  { %2406 = vmatpush1.bf16.msra.mxu0 %v2405_v63  ;;  %2438 = vmatpush1.bf16.msra.mxu1 %v2437_v0  ;;  %v2457_v63 = vpack.c.bf16 %v526_v54, %v502_v53  ;;  %v2489_v0 = vpack.c.bf16 %v528_v58, %v504_v57  ;;  %v2475_v53 = vpack.c.bf16 %v767_v47, %v743_v46  ;;  %v768_v57 = vld [vmem:[#allocation13 + $0xbf0] sm:$0xff] }
 0x342   :  { %2408 = vmatprep.subr.bf16.mxu0 %v2407_v4  ;;  %2440 = vmatprep.subr.bf16.mxu1 %v2439_v5  ;;  %v2459_v4 = vpack.c.bf16 %v575_v60, %v551_v59  ;;  %v2491_v5 = vpack.c.bf16 %v577_v62, %v553_v61  ;;  %v2507_v54 = vpack.c.bf16 %v769_v49, %v745_v48  ;;  %v3055_v60 = vsub.s32 2, %v3020_v43  ;;  %v3057_v61 = vld [vmem:[#allocation15] sm:$0xff] }
 0x343   :  { %v3060_v62 = vsub.s32 1, %v3020_v43 }
 0x345   :  { %2410 = vmatpush1.bf16.msra.mxu0 %v2409_v12  ;;  %2442 = vmatpush1.bf16.msra.mxu1 %v2441_v13  ;;  %v2461_v12 = vpack.c.bf16 %v574_v3, %v550_v2  ;;  %v598_v13 = vld [vmem:[#allocation13 + $0x6a0] sm:$0xff]  ;;  %v787_v2 = vrot.slane %v3057_v61, %v3055_v60 }
 0x346   :  { %2412 = vmatprep.subr.bf16.mxu0 %v2411_v17  ;;  %2444 = vmatprep.subr.bf16.mxu1 %v2443_v18  ;;  %v2495_v17 = vpack.c.bf16 %v625_v11, %v601_v10  ;;  %v600_v18 = vld [vmem:[#allocation13 + $0x6b0] sm:$0xff]  ;;  %v2465_v24 = vpack.c.bf16 %v622_v14, %v598_v13 }
 0x349   :  { %2414 = vmatpush1.bf16.msra.mxu0 %v2413_v25  ;;  %2446 = vmatpush1.bf16.msra.mxu1 %v2445_v26  ;;  %v2497_v25 = vpack.c.bf16 %v624_v19, %v600_v18  ;;  %v646_v26 = vld [vmem:[#allocation13 + $0x820] sm:$0xff] }
 0x34a   :  { %2448 = vmatprep.subr.bf16.mxu0 %v2447_v29  ;;  %2480 = vmatprep.subr.bf16.mxu1 %v2479_v30  ;;  %v2499_v29 = vpack.c.bf16 %v673_v23, %v649_v22  ;;  %v648_v30 = vld [vmem:[#allocation13 + $0x830] sm:$0xff]  ;;  %v2469_v36 = vpack.c.bf16 %v670_v27, %v646_v26  ;;  %v3074_v27 = vsub.s32 4, %v3020_v43 }
 0x34c   :  { %1529 = vmatmul.mubr.f32.vlgmr.msra.gmra.mrb[10].mxu0 %v3030_v16  ;;  %1600 = vmatmul.mubr.f32.vlgmr.msra.gmra.mrb[10].mxu1 %v3030_v16 }
 0x34d   :  { %2450 = vmatpush1.bf16.msra.mxu0 %v2449_v37  ;;  %2482 = vmatpush1.bf16.msra.mxu1 %v2481_v38  ;;  %v2501_v37 = vpack.c.bf16 %v672_v31, %v648_v30  ;;  %v694_v38 = vld [vmem:[#allocation13 + $0x9a0] sm:$0xff]  ;;  %v3083_v30 = vsub.s32 7, %v3020_v43 }
 0x34e   :  { %2452 = vmatprep.subr.bf16.mxu0 %v2451_v41  ;;  %2484 = vmatprep.subr.bf16.mxu1 %v2483_v42  ;;  %v2503_v41 = vpack.c.bf16 %v721_v35, %v697_v34  ;;  %v696_v42 = vld [vmem:[#allocation13 + $0x9b0] sm:$0xff]  ;;  %v2473_v50 = vpack.c.bf16 %v718_v39, %v694_v38  ;;  %v795_v34 = vrot.slane %v3057_v61, %v3074_v27 }
 0x34f   :  { %1670 = vmatprep.mubr.f32.mxu0 %v2851_v1  ;;  %1741 = vmatprep.mubr.f32.mxu1 %v2851_v1  ;;  %v2493_v1 = vpack.c.bf16 %v576_v7, %v552_v6  ;;  %v807_v38 = vrot.slane %v3057_v61, %v3083_v30 }
 0x351   :  { %2454 = vmatpush1.bf16.msra.mxu0 %v2453_v51  ;;  %2486 = vmatpush1.bf16.msra.mxu1 %v2485_v52  ;;  %v2505_v51 = vpack.c.bf16 %v720_v44, %v696_v42  ;;  %v742_v52 = vld [vmem:[#allocation13 + $0xb20] sm:$0xff] }
 0x352   :  { %2456 = vmatprep.subr.bf16.mxu0 %v2455_v55  ;;  %2488 = vmatprep.subr.bf16.mxu1 %v2487_v56  ;;  %v766_v55 = vld [vmem:[#allocation13 + $0xbe0] sm:$0xff]  ;;  %v744_v56 = vld [vmem:[#allocation13 + $0xb30] sm:$0xff] }
 0x353   :  { %v2477_v58 = vpack.c.bf16 %v766_v55, %v742_v52  ;;  %v2509_v59 = vpack.c.bf16 %v768_v57, %v744_v56 }
 0x355   :  { %2458 = vmatpush1.bf16.msra.mxu0 %v2457_v63  ;;  %2490 = vmatpush1.bf16.msra.mxu1 %v2489_v0  ;;  %v3063_v63 = vsub.s32 3, %v3020_v43  ;;  %v779_v0 = vrot.slane %v3057_v61, %v3023_v45 }
 0x356   :  { %2460 = vmatprep.subr.bf16.mxu0 %v2459_v4  ;;  %2492 = vmatprep.subr.bf16.mxu1 %v2491_v5 }
 0x357   :  { %v791_v3 = vrot.slane %v3057_v61, %v3063_v63 }
 0x359   :  { %2462 = vmatpush1.bf16.msra.mxu0 %v2461_v12  ;;  %2494 = vmatpush1.bf16.msra.mxu1 %v2493_v1 }
 0x35a   :  { %2464 = vmatprep.subr.bf16.mxu0 %v2463_v15  ;;  %2496 = vmatprep.subr.bf16.mxu1 %v2495_v17 }
 0x35d   :  { %2466 = vmatpush1.bf16.msra.mxu0 %v2465_v24  ;;  %2498 = vmatpush1.bf16.msra.mxu1 %v2497_v25  ;;  %v2852_v24 = vmov 1983009808  }
 0x35e   :  { %2468 = vmatprep.subr.bf16.mxu0 %v2467_v28  ;;  %2500 = vmatprep.subr.bf16.mxu1 %v2499_v29  ;;  %v1919_v25 = vunpack.c.l.s4 %v2852_v24  ;;  %v3077_v28 = vsub.s32 6, %v3020_v43  ;;  %v3080_v29 = vsub.s32 5, %v3020_v43 }
 0x360   :  { %v1920_v26 = vunpack.c.0.s8 %v1919_v25  ;;  %v803_v35 = vrot.slane %v3057_v61, %v3077_v28 }
 0x361   :  { %2470 = vmatpush1.bf16.msra.mxu0 %v2469_v36  ;;  %2502 = vmatpush1.bf16.msra.mxu1 %v2501_v37  ;;  %v799_v37 = vrot.slane %v3057_v61, %v3080_v29 }
 0x362   :  { %2472 = vmatprep.subr.bf16.mxu0 %v2471_v40  ;;  %2504 = vmatprep.subr.bf16.mxu1 %v2503_v41  ;;  %v3086_v33 = vsub.s32 %v1920_v26, %v3020_v43 }
 0x365   :  { %2474 = vmatpush1.bf16.msra.mxu0 %v2473_v50  ;;  %2506 = vmatpush1.bf16.msra.mxu1 %v2505_v51 }
 0x366   :  { %2476 = vmatprep.subr.bf16.mxu0 %v2475_v53  ;;  %2508 = vmatprep.subr.bf16.mxu1 %v2507_v54 }
 0x369   :  { %2478 = vmatpush1.bf16.msra.mxu0 %v2477_v58  ;;  %2510 = vmatpush1.bf16.msra.mxu1 %v2509_v59 }
 0x36c   :  { %1671 = vmatmul.mubr.f32.vlgmr.msra.gmra.mrb[12].mxu0 %v3030_v16  ;;  %1742 = vmatmul.mubr.f32.vlgmr.msra.gmra.mrb[12].mxu1 %v3030_v16  ;;  %v783_v16 = vrot.slane %v3057_v61, %v3060_v62 }
 0x39f   :  { %v962_v4 = vpop.f32.mrb[2].mxu0  ;;  %v1033_v5 = vpop.f32.mrb[2].mxu1 }
 0x3a0   :  { %v963_v6 = vadd.f32 %v962_v4, %v779_v0  ;;  %v1034_v7 = vadd.f32 %v1033_v5, %v787_v2  ;;  %v964_v8 = vpop.f32.mrb[3].mxu0  ;;  %v1035_v9 = vpop.f32.mrb[3].mxu1  ;;  %v3101_v5 = vld [vmem:[#allocation15 + $0x8] sm:$0xff] }
 0x3a1   :  { %v965_v10 = vadd.f32 %v964_v8, %v783_v16  ;;  %v1036_v11 = vadd.f32 %v1035_v9, %v791_v3  ;;  %v811_v8 = vrot.slane %v3101_v5, %v3023_v45  ;;  %v819_v9 = vrot.slane %v3101_v5, %v3055_v60 }
 0x3a2   :  { %v2041_v12 = vmul.f32 -1.442695, %v963_v6  ;;  %v2043_v1 = vmul.f32 -1.442695, %v1034_v7 }
 0x3a3   :  { %v2042_v13 = vmul.f32 -1.442695, %v965_v10  ;;  %v2044_v14 = vmul.f32 -1.442695, %v1036_v11  ;;  %v815_v11 = vrot.slane %v3101_v5, %v3060_v62 }
 0x3a4   :  { %2532 = vpow2.f32 %v2041_v12  ;;  %v823_v12 = vrot.slane %v3101_v5, %v3063_v63 }
 0x3a5   :  { %2534 = vpow2.f32 %v2043_v1 }
 0x3a6   :  { %2536 = vpow2.f32 %v2042_v13 }
 0x3a7   :  { %2538 = vpow2.f32 %v2044_v14 }
 0x3ae   :  { %v2533_v15 = vpop.eup %2532 }
 0x3af   :  { %v2535_v17 = vpop.eup %2534  ;;  %v1820_v18 = vadd.f32 1.0, %v2533_v15 }
 0x3b0   :  { %v2537_v19 = vpop.eup %2536  ;;  %v1822_v20 = vadd.f32 1.0, %v2535_v17 }
 0x3b1   :  { %v2539_v21 = vpop.eup %2538  ;;  %2540 = vrcp.f32 %v1820_v18  ;;  %v1821_v22 = vadd.f32 1.0, %v2537_v19 }
 0x3b2   :  { %2542 = vrcp.f32 %v1822_v20  ;;  %v1823_v23 = vadd.f32 1.0, %v2539_v21 }
 0x3b3   :  { %2544 = vrcp.f32 %v1821_v22 }
 0x3b4   :  { %2546 = vrcp.f32 %v1823_v23 }
 0x3bb   :  { %v2541_v31 = vpop.eup %2540 }
 0x3bc   :  { %v2543_v32 = vpop.eup %2542 }
 0x3bd   :  { %v2545_v36 = vpop.eup %2544 }
 0x3be   :  { %v2547_v39 = vpop.eup %2546  ;;  %v1916_v40 = vcombine.low %v2541_v31, %v2545_v36 }
 0x3bf   :  { %v1917_v41 = vcombine.low %v2543_v32, %v2547_v39  ;;  %v1104_v42 = vpop.f32.mrb[4].mxu0  ;;  %v1175_v44 = vpop.f32.mrb[4].mxu1 }
 0x3c0   :  { %v1924_v43 = vrot.slane %v1916_v40, %v3086_v33  ;;  %v1105_v46 = vadd.f32 %v1104_v42, %v795_v34  ;;  %v1176_v47 = vadd.f32 %v1175_v44, %v803_v35  ;;  %v1106_v48 = vpop.f32.mrb[5].mxu0  ;;  %v1177_v49 = vpop.f32.mrb[5].mxu1 }
 0x3c1   :  { %v1931_v50 = vrot.slane %v1917_v41, %v3086_v33  ;;  %v1107_v51 = vadd.f32 %v1106_v48, %v799_v37  ;;  %v1178_v52 = vadd.f32 %v1177_v49, %v807_v38  ;;  %v835_v48 = vrot.slane %v3101_v5, %v3077_v28 }
 0x3c2   :  { %v2045_v53 = vmul.f32 -1.442695, %v1105_v46  ;;  %v2047_v54 = vmul.f32 -1.442695, %v1176_v47  ;;  %v827_v47 = vrot.slane %v3101_v5, %v3074_v27 }
 0x3c3   :  { %v1932_v55 = vcombine.low %v1924_v43, %v1931_v50  ;;  %v2046_v56 = vmul.f32 -1.442695, %v1107_v51  ;;  %v2048_v57 = vmul.f32 -1.442695, %v1178_v52  ;;  %v831_v50 = vrot.slane %v3101_v5, %v3080_v29 }
 0x3c4   :  { %2548 = vpow2.f32 %v2045_v53  ;;  %v839_v51 = vrot.slane %v3101_v5, %v3083_v30 }
 0x3c5   :  { %2024 = vst [vmem:[%s3171_s9] sm:$0xff] %v1932_v55  ;;  %2550 = vpow2.f32 %v2047_v54 }
 0x3c6   :  { %2552 = vpow2.f32 %v2046_v56 }
 0x3c7   :  { %2554 = vpow2.f32 %v2048_v57 }
 0x3ce   :  { %v2549_v58 = vpop.eup %2548 }
 0x3cf   :  { %v2551_v59 = vpop.eup %2550  ;;  %v1824_v61 = vadd.f32 1.0, %v2549_v58 }
 0x3d0   :  { %v2553_v0 = vpop.eup %2552  ;;  %v1826_v2 = vadd.f32 1.0, %v2551_v59 }
 0x3d1   :  { %v2555_v16 = vpop.eup %2554  ;;  %2556 = vrcp.f32 %v1824_v61  ;;  %v1825_v3 = vadd.f32 1.0, %v2553_v0 }
 0x3d2   :  { %2558 = vrcp.f32 %v1826_v2  ;;  %v1827_v4 = vadd.f32 1.0, %v2555_v16 }
 0x3d3   :  { %2560 = vrcp.f32 %v1825_v3 }
 0x3d4   :  { %2562 = vrcp.f32 %v1827_v4 }
 0x3db   :  { %v2557_v6 = vpop.eup %2556 }
 0x3dc   :  { %v2559_v7 = vpop.eup %2558 }
 0x3dd   :  { %v2561_v10 = vpop.eup %2560 }
 0x3de   :  { %v2563_v1 = vpop.eup %2562  ;;  %v1933_v13 = vcombine.low %v2557_v6, %v2561_v10 }
 0x3df   :  { %v1934_v14 = vcombine.low %v2559_v7, %v2563_v1  ;;  %v1246_v15 = vpop.f32.mrb[6].mxu0  ;;  %v1317_v17 = vpop.f32.mrb[6].mxu1 }
 0x3e0   :  { %v1941_v18 = vrot.slane %v1933_v13, %v3086_v33  ;;  %v1247_v19 = vadd.f32 %v1246_v15, %v811_v8  ;;  %v1318_v20 = vadd.f32 %v1317_v17, %v819_v9  ;;  %v1248_v21 = vpop.f32.mrb[7].mxu0  ;;  %v1319_v22 = vpop.f32.mrb[7].mxu1  ;;  %v3129_v17 = vld [vmem:[#allocation15 + $0x10] sm:$0xff] }
 0x3e1   :  { %v1948_v23 = vrot.slane %v1934_v14, %v3086_v33  ;;  %v1249_v24 = vadd.f32 %v1248_v21, %v815_v11  ;;  %v1320_v25 = vadd.f32 %v1319_v22, %v823_v12  ;;  %v851_v21 = vrot.slane %v3129_v17, %v3055_v60 }
 0x3e2   :  { %v2049_v26 = vmul.f32 -1.442695, %v1247_v19  ;;  %v2051_v31 = vmul.f32 -1.442695, %v1318_v20  ;;  %v843_v20 = vrot.slane %v3129_v17, %v3023_v45 }
 0x3e3   :  { %v1949_v32 = vcombine.low %v1941_v18, %v1948_v23  ;;  %v2050_v34 = vmul.f32 -1.442695, %v1249_v24  ;;  %v2052_v35 = vmul.f32 -1.442695, %v1320_v25  ;;  %v847_v23 = vrot.slane %v3129_v17, %v3060_v62 }
 0x3e4   :  { %2564 = vpow2.f32 %v2049_v26  ;;  %v855_v24 = vrot.slane %v3129_v17, %v3063_v63 }
 0x3e5   :  { %2025 = vst [vmem:[%s3171_s9 + $0x8] sm:$0xff] %v1949_v32  ;;  %2566 = vpow2.f32 %v2051_v31 }
 0x3e6   :  { %2568 = vpow2.f32 %v2050_v34 }
 0x3e7   :  { %2570 = vpow2.f32 %v2052_v35 }
 0x3ee   :  { %v2565_v36 = vpop.eup %2564 }
 0x3ef   :  { %v2567_v37 = vpop.eup %2566  ;;  %v1828_v38 = vadd.f32 1.0, %v2565_v36 }
 0x3f0   :  { %v2569_v39 = vpop.eup %2568  ;;  %v1830_v40 = vadd.f32 1.0, %v2567_v37 }
 0x3f1   :  { %v2571_v41 = vpop.eup %2570  ;;  %2572 = vrcp.f32 %v1828_v38  ;;  %v1829_v42 = vadd.f32 1.0, %v2569_v39 }
 0x3f2   :  { %2574 = vrcp.f32 %v1830_v40  ;;  %v1831_v44 = vadd.f32 1.0, %v2571_v41 }
 0x3f3   :  { %2576 = vrcp.f32 %v1829_v42 }
 0x3f4   :  { %2578 = vrcp.f32 %v1831_v44 }
 0x3fb   :  { %v2573_v43 = vpop.eup %2572 }
 0x3fc   :  { %v2575_v46 = vpop.eup %2574 }
 0x3fd   :  { %v2577_v49 = vpop.eup %2576 }
 0x3fe   :  { %v2579_v52 = vpop.eup %2578  ;;  %v1950_v53 = vcombine.low %v2573_v43, %v2577_v49 }
 0x3ff   :  { %v1951_v54 = vcombine.low %v2575_v46, %v2579_v52  ;;  %v1388_v55 = vpop.f32.mrb[8].mxu0  ;;  %v1459_v56 = vpop.f32.mrb[8].mxu1 }
 0x400   :  { %v1958_v57 = vrot.slane %v1950_v53, %v3086_v33  ;;  %v1389_v58 = vadd.f32 %v1388_v55, %v827_v47  ;;  %v1460_v59 = vadd.f32 %v1459_v56, %v835_v48  ;;  %v1390_v61 = vpop.f32.mrb[9].mxu0  ;;  %v1461_v0 = vpop.f32.mrb[9].mxu1  ;;  %v859_v55 = vrot.slane %v3129_v17, %v3074_v27 }
 0x401   :  { %v1965_v2 = vrot.slane %v1951_v54, %v3086_v33  ;;  %v1391_v16 = vadd.f32 %v1390_v61, %v831_v50  ;;  %v1462_v3 = vadd.f32 %v1461_v0, %v839_v51  ;;  %v867_v56 = vrot.slane %v3129_v17, %v3077_v28 }
 0x402   :  { %v2053_v4 = vmul.f32 -1.442695, %v1389_v58  ;;  %v2055_v6 = vmul.f32 -1.442695, %v1460_v59  ;;  %v863_v58 = vrot.slane %v3129_v17, %v3080_v29  ;;  %v871_v59 = vrot.slane %v3129_v17, %v3083_v30 }
 0x403   :  { %v1966_v7 = vcombine.low %v1958_v57, %v1965_v2  ;;  %v2054_v8 = vmul.f32 -1.442695, %v1391_v16  ;;  %v2056_v5 = vmul.f32 -1.442695, %v1462_v3 }
 0x404   :  { %2580 = vpow2.f32 %v2053_v4 }
 0x405   :  { %2026 = vst [vmem:[%s3171_s9 + $0x10] sm:$0xff] %v1966_v7  ;;  %2582 = vpow2.f32 %v2055_v6 }
 0x406   :  { %2584 = vpow2.f32 %v2054_v8 }
 0x407   :  { %2586 = vpow2.f32 %v2056_v5 }
 0x40e   :  { %v2581_v9 = vpop.eup %2580 }
 0x40f   :  { %v2583_v10 = vpop.eup %2582  ;;  %v1832_v11 = vadd.f32 1.0, %v2581_v9 }
 0x410   :  { %v2585_v12 = vpop.eup %2584  ;;  %v1834_v1 = vadd.f32 1.0, %v2583_v10 }
 0x411   :  { %v2587_v13 = vpop.eup %2586  ;;  %2588 = vrcp.f32 %v1832_v11  ;;  %v1833_v14 = vadd.f32 1.0, %v2585_v12 }
 0x412   :  { %2590 = vrcp.f32 %v1834_v1  ;;  %v1835_v15 = vadd.f32 1.0, %v2587_v13 }
 0x413   :  { %2592 = vrcp.f32 %v1833_v14 }
 0x414   :  { %2594 = vrcp.f32 %v1835_v15 }
 0x41b   :  { %v2589_v18 = vpop.eup %2588 }
 0x41c   :  { %v2591_v19 = vpop.eup %2590 }
 0x41d   :  { %v2593_v22 = vpop.eup %2592 }
 0x41e   :  { %v2595_v25 = vpop.eup %2594  ;;  %v1967_v26 = vcombine.low %v2589_v18, %v2593_v22 }
 0x41f   :  { %v1968_v31 = vcombine.low %v2591_v19, %v2595_v25  ;;  %v1530_v32 = vpop.f32.mrb[10].mxu0  ;;  %v1601_v34 = vpop.f32.mrb[10].mxu1 }
 0x420   :  { %v1975_v35 = vrot.slane %v1967_v26, %v3086_v33  ;;  %v1531_v36 = vadd.f32 %v1530_v32, %v843_v20  ;;  %v1602_v37 = vadd.f32 %v1601_v34, %v851_v21  ;;  %v1532_v45 = vpop.f32.mrb[11].mxu0  ;;  %v1603_v38 = vpop.f32.mrb[11].mxu1 }
 0x421   :  { %v1982_v60 = vrot.slane %v1968_v31, %v3086_v33  ;;  %v1533_v39 = vadd.f32 %v1532_v45, %v847_v23  ;;  %v1604_v40 = vadd.f32 %v1603_v38, %v855_v24 }
 0x422   :  { %v2057_v41 = vmul.f32 -1.442695, %v1531_v36  ;;  %v2059_v62 = vmul.f32 -1.442695, %v1602_v37 }
 0x423   :  { %v1983_v42 = vcombine.low %v1975_v35, %v1982_v60  ;;  %v2058_v44 = vmul.f32 -1.442695, %v1533_v39  ;;  %v2060_v63 = vmul.f32 -1.442695, %v1604_v40 }
 0x424   :  { %2596 = vpow2.f32 %v2057_v41 }
 0x425   :  { %2027 = vst [vmem:[%s3171_s9 + $0x18] sm:$0xff] %v1983_v42  ;;  %2598 = vpow2.f32 %v2059_v62 }
 0x426   :  { %2600 = vpow2.f32 %v2058_v44 }
 0x427   :  { %2602 = vpow2.f32 %v2060_v63 }
 0x42e   :  { %v2597_v43 = vpop.eup %2596 }
 0x42f   :  { %v2599_v46 = vpop.eup %2598  ;;  %v1836_v47 = vadd.f32 1.0, %v2597_v43 }
 0x430   :  { %v2601_v48 = vpop.eup %2600  ;;  %v1838_v49 = vadd.f32 1.0, %v2599_v46 }
 0x431   :  { %v2603_v50 = vpop.eup %2602  ;;  %2604 = vrcp.f32 %v1836_v47  ;;  %v1837_v51 = vadd.f32 1.0, %v2601_v48 }
 0x432   :  { %2606 = vrcp.f32 %v1838_v49  ;;  %v1839_v52 = vadd.f32 1.0, %v2603_v50 }
 0x433   :  { %2608 = vrcp.f32 %v1837_v51 }
 0x434   :  { %2610 = vrcp.f32 %v1839_v52 }
 0x43b   :  { %v2605_v53 = vpop.eup %2604 }
 0x43c   :  { %v2607_v54 = vpop.eup %2606 }
 0x43d   :  { %v2609_v57 = vpop.eup %2608 }
 0x43e   :  { %v2611_v61 = vpop.eup %2610  ;;  %v1984_v0 = vcombine.low %v2605_v53, %v2609_v57 }
 0x43f   :  { %v1985_v2 = vcombine.low %v2607_v54, %v2611_v61  ;;  %v1672_v16 = vpop.f32.mrb[12].mxu0  ;;  %v1743_v3 = vpop.f32.mrb[12].mxu1 }
 0x440   :  { %v1992_v4 = vrot.slane %v1984_v0, %v3086_v33  ;;  %v1673_v6 = vadd.f32 %v1672_v16, %v859_v55  ;;  %v1744_v7 = vadd.f32 %v1743_v3, %v867_v56  ;;  %v1674_v27 = vpop.f32.mrb[13].mxu0  ;;  %v1745_v8 = vpop.f32.mrb[13].mxu1 }
 0x441   :  { %v1999_v28 = vrot.slane %v1985_v2, %v3086_v33  ;;  %v1675_v5 = vadd.f32 %v1674_v27, %v863_v58  ;;  %v1746_v9 = vadd.f32 %v1745_v8, %v871_v59 }
 0x442   :  { %v2061_v10 = vmul.f32 -1.442695, %v1673_v6  ;;  %v2063_v29 = vmul.f32 -1.442695, %v1744_v7 }
 0x443   :  { %v2000_v11 = vcombine.low %v1992_v4, %v1999_v28  ;;  %v2062_v12 = vmul.f32 -1.442695, %v1675_v5  ;;  %v2064_v30 = vmul.f32 -1.442695, %v1746_v9 }
 0x444   :  { %2612 = vpow2.f32 %v2061_v10 }
 0x445   :  { %2028 = vst [vmem:[%s3171_s9 + $0x20] sm:$0xff] %v2000_v11  ;;  %2614 = vpow2.f32 %v2063_v29 }
 0x446   :  { %2616 = vpow2.f32 %v2062_v12 }
 0x447   :  { %2618 = vpow2.f32 %v2064_v30 }
 0x44e   :  { %v2613_v1 = vpop.eup %2612 }
 0x44f   :  { %v2615_v13 = vpop.eup %2614  ;;  %v1840_v14 = vadd.f32 1.0, %v2613_v1 }
 0x450   :  { %v2617_v15 = vpop.eup %2616  ;;  %v1842_v17 = vadd.f32 1.0, %v2615_v13 }
 0x451   :  { %v2619_v18 = vpop.eup %2618  ;;  %2620 = vrcp.f32 %v1840_v14  ;;  %v1841_v19 = vadd.f32 1.0, %v2617_v15 }
 0x452   :  { %2622 = vrcp.f32 %v1842_v17  ;;  %v1843_v20 = vadd.f32 1.0, %v2619_v18 }
 0x453   :  { %2624 = vrcp.f32 %v1841_v19 }
 0x454   :  { %2626 = vrcp.f32 %v1843_v20 }
 0x45b   :  { %v2621_v21 = vpop.eup %2620 }
 0x45c   :  { %v2623_v22 = vpop.eup %2622 }
 0x45d   :  { %v2625_v23 = vpop.eup %2624 }
 0x45e   :  { %v2627_v24 = vpop.eup %2626  ;;  %v2001_v25 = vcombine.low %v2621_v21, %v2625_v23 }
 0x45f   :  { %v2002_v26 = vcombine.low %v2623_v22, %v2627_v24 }
 0x460   :  { %v2009_v31 = vrot.slane %v2001_v25, %v3086_v33 }
 0x461   :  { %v2016_v32 = vrot.slane %v2002_v26, %v3086_v33 }
 0x463   :  { %v2017_v34 = vcombine.low %v2009_v31, %v2016_v32 }
 0x465   :  { %2029 = vst [vmem:[%s3171_s9 + $0x28] sm:$0xff] %v2017_v34 }
 0x466   :  { %2034 = vsyncpa [#allocation3], 1 }
 0x467   :  { %2035 = vsyncpa [#allocation5], 1 }
 0x468   :  { %2036 = vsyncpa [#allocation8], 1 }
 0x469   :  { %2037 = vsyncpa [#allocation11], 1 }
 0x46a   :  { %2038 = vsyncpa [#allocation14], 1 }

</bundles_post_ra>
